<compile_context>
chip_gen: v6e
topology: v6e:2x2x1
jax: 0.10.0
libtpu: 0.0.40
codegen_flags: <defaults>
</compile_context>

<pallas_src>
import functools

import numpy as np
import jax
import jax.numpy as jnp
from jax import lax
from jax.experimental import pallas as pl
from jax.experimental.pallas import tpu as pltpu

PAD = 0
LN_EPS = 1e-6
NEG_INF = -1e9  # stands in for masked_fill(-inf)


def _add_layer_norm(y, x, gamma, beta):
    """LayerNorm(y + x) with affine params (1, D) — f32 VPU math."""
    z = y + x
    mu = jnp.mean(z, axis=-1, keepdims=True)
    var = jnp.mean(jnp.square(z - mu), axis=-1, keepdims=True)
    return (z - mu) * lax.rsqrt(var + LN_EPS) * gamma + beta


# --------------------------------------------------------------------------
# Fused decoder kernel: grid = (batch_chunks, n_dec); one inner step == layer.
# --------------------------------------------------------------------------
def decoder_kernel(x0_ref, enc_ref, dec_pad_ref, enc_pad_ref,
                   swqkv_ref, swo_ref, sp_ref,
                   ewq_ref, ewkv_ref, ewo_ref, ep_ref,
                   fw1_ref, fb1_ref, fw2_ref, fp_ref,
                   o_ref,
                   slf_add_ref, enc_add_ref,
                   *, n_head, d_k, Bc, Lq, Lk):
    """Per grid step (b, l): batch-chunk b, decoder layer l.
      x0_ref      : (1, Bc*Lq, D)  f32  embedded decoder input (read at l==0)
      enc_ref     : (1, 1, Bc*Lk, D) bf16 this layer's encoder output chunk
      dec_pad_ref : (1, Bc, Lq)    f32  1.0 where dec_input == PAD
      enc_pad_ref : (1, Bc, Lk)    f32  1.0 where enc_input == PAD
      weights     : bf16 stacks blocked by l; sp/ep/fp packed f32 [bias;g;b]
      o_ref       : (1, Bc*Lq, D)  f32  carried activation (constant block
                                        index over l => VMEM-resident)
      slf_add_ref : (Bc, Lq, Lq)   f32  additive self-attn mask (scratch)
      enc_add_ref : (Bc, Lq, Lk)   f32  additive cross-attn mask (scratch)
    """
    D = n_head * d_k
    l = pl.program_id(1)

    # ---- once per batch chunk: seed activation, build additive masks -------
    @pl.when(l == 0)
    def _():
        o_ref[0] = x0_ref[0]
        col = lax.broadcasted_iota(jnp.int32, (Lq, Lq), 1)
        row = lax.broadcasted_iota(jnp.int32, (Lq, Lq), 0)
        causal = (col > row).astype(jnp.float32)          # subsequent mask
        # torch.gt(pad_mask + subsequent_mask, 0): > 0 == masked
        slf = dec_pad_ref[0][:, None, :] + causal[None, :, :]     # (Bc,Lq,Lq)
        slf_add_ref[...] = jnp.where(slf > 0.5, jnp.float32(NEG_INF),
                                     jnp.float32(0.0))
        enc_add_ref[...] = jnp.broadcast_to(
            jnp.where(enc_pad_ref[0][:, None, :] > 0.5, jnp.float32(NEG_INF),
                      jnp.float32(0.0)),
            (Bc, Lq, Lk))

    x2 = o_ref[0]                                         # (Bc*Lq, D) f32
    inv_temper = 1.0 / float(np.sqrt(d_k))

    def split_heads(t):
        """(Bc, L, D) -> (n_head*Bc, L, d_k), head-major along the batch."""
        return jnp.concatenate(
            [t[:, :, h * d_k:(h + 1) * d_k] for h in range(n_head)], axis=0)

    def mha_core(Q, K, V, add_ref, wo, bo):
        """Q: (Bc,Lq,D), K/V: (Bc,Lkv,D) f32; add_ref: (Bc,Lq,Lkv) additive
        mask; wo: (D,D) bf16; bo: (1,D) f32.  Returns (Bc*Lq, D) f32."""
        Lkv = K.shape[1]
        Qh = split_heads(Q).astype(jnp.bfloat16)          # (H*Bc, Lq, d_k)
        Kh = split_heads(K).astype(jnp.bfloat16)          # (H*Bc, Lkv, d_k)
        Vh = split_heads(V).astype(jnp.bfloat16)
        # one MXU stream for all heads
        s = jnp.einsum('bqd,bkd->bqk', Qh, Kh,
                       preferred_element_type=jnp.float32) * inv_temper
        # additive mask, shared across heads (leading-dim reshape is free)
        s = (s.reshape(n_head, Bc, Lq, Lkv)
             + add_ref[...][None, :, :, :]).reshape(n_head * Bc, Lq, Lkv)
        s = s - jnp.max(s, axis=-1, keepdims=True)
        e = jnp.exp(s)
        p = e * pl.reciprocal(jnp.sum(e, axis=-1, keepdims=True),
                              approx=True)                # softmax (EUP divide)
        # TODO(synk): attention dropout omitted (inference semantics).
        ctx = jnp.einsum('bqk,bkd->bqd', p.astype(jnp.bfloat16), Vh,
                         preferred_element_type=jnp.float32)  # (H*Bc,Lq,d_k)
        # re-merge heads onto the lane axis, then ONE full-width Wo matmul
        ctx_full = jnp.concatenate(
            [ctx[h * Bc:(h + 1) * Bc] for h in range(n_head)], axis=-1)
        ctx_full = ctx_full.reshape(Bc * Lq, D).astype(jnp.bfloat16)
        return jnp.dot(ctx_full, wo, preferred_element_type=jnp.float32) + bo

    # ---- masked self-attention sublayer ------------------------------------
    x2_bf = x2.astype(jnp.bfloat16)
    qkv = jnp.dot(x2_bf, swqkv_ref[0],
                  preferred_element_type=jnp.float32)     # (Bc*Lq, 3D) f32
    Q = qkv[:, 0:D].reshape(Bc, Lq, D)
    K = qkv[:, D:2 * D].reshape(Bc, Lq, D)
    V = qkv[:, 2 * D:3 * D].reshape(Bc, Lq, D)
    sp = sp_ref[0]                                        # (3, D) [bo;g;b]
    a = mha_core(Q, K, V, slf_add_ref, swo_ref[0], sp[0:1, :])
    x2 = _add_layer_norm(a, x2, sp[1:2, :], sp[2:3, :])

    # ---- encoder-decoder attention sublayer --------------------------------
    enc2 = enc_ref[0, 0]                                  # (Bc*Lk, D) bf16
    x2_bf = x2.astype(jnp.bfloat16)
    Qe = jnp.dot(x2_bf, ewq_ref[0],
                 preferred_element_type=jnp.float32).reshape(Bc, Lq, D)
    kv = jnp.dot(enc2, ewkv_ref[0],
                 preferred_element_type=jnp.float32)      # (Bc*Lk, 2D) f32
    Ke = kv[:, 0:D].reshape(Bc, Lk, D)
    Ve = kv[:, D:2 * D].reshape(Bc, Lk, D)
    ep = ep_ref[0]
    a = mha_core(Qe, Ke, Ve, enc_add_ref, ewo_ref[0], ep[0:1, :])
    x2 = _add_layer_norm(a, x2, ep[1:2, :], ep[2:3, :])

    # ---- position-wise FFN (Conv1d k=1 == matmul) ---------------------------
    x2_bf = x2.astype(jnp.bfloat16)
    h1 = jnp.dot(x2_bf, fw1_ref[0],
                 preferred_element_type=jnp.float32) + fb1_ref[0]
    h1 = jnp.maximum(h1, 0.0).astype(jnp.bfloat16)        # ReLU
    y = jnp.dot(h1, fw2_ref[0], preferred_element_type=jnp.float32)
    fp = fp_ref[0]                                        # (3, D) [b2;g;b]
    x2 = _add_layer_norm(y + fp[0:1, :], x2, fp[1:2, :], fp[2:3, :])

    o_ref[0] = x2


# --------------------------------------------------------------------------
# Wrapper: single fused pallas_call over (batch chunks, decoder layers).
# --------------------------------------------------------------------------
def decoder_forward(params, enc_outputs, enc_input, dec_input, dec_pos, n_head,
                    batch_chunks=None):
    B, Lq = dec_input.shape
    Lk = enc_input.shape[1]
    D = params["dec_ebd"].shape[1]
    n_dec = params["slf_wqkv"].shape[0]
    d_ff = params["ffn_w1"].shape[2]
    assert D % n_head == 0
    d_k = D // n_head

    # Batch-parallel leading grid axis: lets v7x's 2 TensorCores both work;
    # harmless (extra weight re-fetch only) on 1-TC v5e/v6e.
    if batch_chunks is None:
        batch_chunks = 2 if B % 2 == 0 else 1
    assert B % batch_chunks == 0
    Bc = B // batch_chunks

    # Embedding lookups (gather) — plain-JAX glue outside the kernel.
    x0 = (jnp.take(params["dec_ebd"], dec_input, axis=0)
          + jnp.take(params["pos_ebd"], dec_pos, axis=0))
    x0 = x0.astype(jnp.float32).reshape(batch_chunks, Bc * Lq, D)

    # Only the (B, L) padding indicators go to the kernel; O(L^2) additive
    # masks are generated once per batch chunk in-kernel (VMEM scratch).
    dec_pad = (dec_input == PAD).astype(jnp.float32).reshape(batch_chunks, Bc, Lq)
    enc_pad = (enc_input == PAD).astype(jnp.float32).reshape(batch_chunks, Bc, Lk)

    enc_stack = jnp.stack(list(enc_outputs), axis=0).reshape(
        n_dec, batch_chunks, Bc * Lk, D).astype(jnp.bfloat16)

    # Explicit VMEM budget from the actual per-layer buffer set (bf16 weights,
    # double-buffered inputs, f32 activation + mask scratch) + headroom.
    w_layer = 2 * (8 * D * D + 2 * D * d_ff) + 4 * (9 * D + d_ff)
    act = 4 * (2 * Bc * Lq * D) + 2 * (Bc * Lk * D) + 4 * (Bc * (Lq + Lk))
    scratch = 4 * (Bc * Lq * (Lq + Lk))
    vmem_limit = int(2.5 * (w_layer + act)) + scratch + (8 << 20)
    vmem_limit = min(max(vmem_limit, 32 << 20), 64 << 20)  # safe on v5e/v6e/v7x

    kern = functools.partial(decoder_kernel, n_head=n_head, d_k=d_k,
                             Bc=Bc, Lq=Lq, Lk=Lk)

    out = pl.pallas_call(
        kern,
        out_shape=jax.ShapeDtypeStruct((batch_chunks, Bc * Lq, D), jnp.float32),
        grid=(batch_chunks, n_dec),
        in_specs=[
            pl.BlockSpec((1, Bc * Lq, D), lambda b, l: (b, 0, 0)),      # x0
            pl.BlockSpec((1, 1, Bc * Lk, D), lambda b, l: (l, b, 0, 0)),# enc[l]
            pl.BlockSpec((1, Bc, Lq), lambda b, l: (b, 0, 0)),          # dec pad
            pl.BlockSpec((1, Bc, Lk), lambda b, l: (b, 0, 0)),          # enc pad
            pl.BlockSpec((1, D, 3 * D), lambda b, l: (l, 0, 0)),        # slf Wqkv
            pl.BlockSpec((1, D, D), lambda b, l: (l, 0, 0)),            # slf Wo
            pl.BlockSpec((1, 3, D), lambda b, l: (l, 0, 0)),            # slf [bo;g;b]
            pl.BlockSpec((1, D, D), lambda b, l: (l, 0, 0)),            # enc Wq
            pl.BlockSpec((1, D, 2 * D), lambda b, l: (l, 0, 0)),        # enc Wkv
            pl.BlockSpec((1, D, D), lambda b, l: (l, 0, 0)),            # enc Wo
            pl.BlockSpec((1, 3, D), lambda b, l: (l, 0, 0)),            # enc [bo;g;b]
            pl.BlockSpec((1, D, d_ff), lambda b, l: (l, 0, 0)),         # ffn W1
            pl.BlockSpec((1, 1, d_ff), lambda b, l: (l, 0, 0)),         # ffn b1
            pl.BlockSpec((1, d_ff, D), lambda b, l: (l, 0, 0)),         # ffn W2
            pl.BlockSpec((1, 3, D), lambda b, l: (l, 0, 0)),            # ffn [b2;g;b]
        ],
        # Constant block index across the layer axis => activation stays
        # resident in VMEM for all layers of a batch chunk.
        out_specs=pl.BlockSpec((1, Bc * Lq, D), lambda b, l: (b, 0, 0)),
        scratch_shapes=[pltpu.VMEM((Bc, Lq, Lq), jnp.float32),   # slf add-mask
                        pltpu.VMEM((Bc, Lq, Lk), jnp.float32)],  # enc add-mask
        compiler_params=pltpu.CompilerParams(
            dimension_semantics=("parallel", "arbitrary"),
            vmem_limit_bytes=vmem_limit),
    )(x0, enc_stack, dec_pad, enc_pad,
      params["slf_wqkv"], params["slf_wo"], params["slf_p"],
      params["enc_wq"], params["enc_wkv"], params["enc_wo"], params["enc_p"],
      params["ffn_w1"], params["ffn_b1"], params["ffn_w2"], params["ffn_p"])

    return out.reshape(B, Lq, D)


# --------------------------------------------------------------------------
# Plain-JAX glue: position table & parameter init (stacked / packed layout)
# --------------------------------------------------------------------------
def position_table(n_position, d_model):
    """Sinusoidal table; row 0 (PAD) is all zeros (matches `position(...)`)."""
    pos = np.arange(n_position)[:, None].astype(np.float64)
    j = np.arange(d_model)[None, :]
    angle = pos / np.power(10000.0, 2 * (j // 2) / d_model)
    table = np.zeros((n_position, d_model), np.float32)
    table[1:, 0::2] = np.sin(angle[1:, 0::2])
    table[1:, 1::2] = np.cos(angle[1:, 1::2])
    return jnp.asarray(table)


def init_decoder_params(key, dec_vocab_size, max_word_len, n_dec, d_model, d_ff,
                        n_head):
    del n_head  # head split is a static view of the (D, D) projections
    n_position = max_word_len + 1
    keys = jax.random.split(key, 1 + n_dec)

    # dec_ebd: uniform(-0.1, 0.1) — _init_weight overwrites the PAD row too.
    dec_ebd = jax.random.uniform(keys[0], (dec_vocab_size, d_model),
                                 jnp.float32, -0.1, 0.1)
    pos_ebd = position_table(n_position, d_model)   # frozen sinusoidal table

    def lin(k, fan_in, shape):
        bound = 1.0 / float(np.sqrt(fan_in))
        return jax.random.uniform(k, shape, jnp.float32, -bound, bound)

    ones = jnp.ones((1, d_model), jnp.float32)
    zeros = jnp.zeros((1, d_model), jnp.float32)

    slf_wqkv, slf_wo, slf_p = [], [], []
    enc_wq, enc_wkv, enc_wo, enc_p = [], [], [], []
    ffn_w1, ffn_b1, ffn_w2, ffn_p = [], [], [], []
    for i in range(n_dec):
        lk = jax.random.split(keys[1 + i], 14)
        # self-attention (Q/K/V fused column-wise; no Q/K/V bias — assumption)
        wq = lin(lk[0], d_model, (d_model, d_model))
        wk = lin(lk[1], d_model, (d_model, d_model))
        wv = lin(lk[2], d_model, (d_model, d_model))
        wo = lin(lk[3], d_model, (d_model, d_model))
        bo = lin(lk[4], d_model, (1, d_model))
        slf_wqkv.append(jnp.concatenate([wq, wk, wv], axis=1))
        slf_wo.append(wo)
        slf_p.append(jnp.concatenate([bo, ones, zeros], axis=0))
        # encoder-decoder attention (K/V fused)
        wq = lin(lk[5], d_model, (d_model, d_model))
        wk = lin(lk[6], d_model, (d_model, d_model))
        wv = lin(lk[7], d_model, (d_model, d_model))
        wo = lin(lk[8], d_model, (d_model, d_model))
        bo = lin(lk[9], d_model, (1, d_model))
        enc_wq.append(wq)
        enc_wkv.append(jnp.concatenate([wk, wv], axis=1))
        enc_wo.append(wo)
        enc_p.append(jnp.concatenate([bo, ones, zeros], axis=0))
        # position-wise FFN
        w1 = lin(lk[10], d_model, (d_model, d_ff))
        b1 = lin(lk[11], d_model, (1, d_ff))
        w2 = lin(lk[12], d_ff, (d_ff, d_model))
        b2 = lin(lk[13], d_ff, (1, d_model))
        ffn_w1.append(w1)
        ffn_b1.append(b1)
        ffn_w2.append(w2)
        ffn_p.append(jnp.concatenate([b2, ones, zeros], axis=0))

    stk_bf16 = lambda xs: jnp.stack(xs, axis=0).astype(jnp.bfloat16)  # MXU inputs
    stk_f32 = lambda xs: jnp.stack(xs, axis=0)                        # bias/LN
    return dict(dec_ebd=dec_ebd, pos_ebd=pos_ebd,
                slf_wqkv=stk_bf16(slf_wqkv), slf_wo=stk_bf16(slf_wo),
                slf_p=stk_f32(slf_p),
                enc_wq=stk_bf16(enc_wq), enc_wkv=stk_bf16(enc_wkv),
                enc_wo=stk_bf16(enc_wo), enc_p=stk_f32(enc_p),
                ffn_w1=stk_bf16(ffn_w1), ffn_b1=stk_f32(ffn_b1),
                ffn_w2=stk_bf16(ffn_w2), ffn_p=stk_f32(ffn_p))


# --------------------------------------------------------------------------
if __name__ == "__main__":
    key = jax.random.PRNGKey(0)

    # Module hyper-parameters (small, consistent with the forward pass).
    # TODO(synk): production shapes should keep D / d_ff multiples of 128 and
    #             B*L multiples of 8 for vreg-aligned tiles.
    dec_vocab_size, max_word_len = 50, 16
    n_dec, d_model, d_ff, n_head, dropout = 2, 32, 64, 4, 0.1
    B, Lq, Lk = 2, 8, 8

    pkey, ekey, dkey, ikey = jax.random.split(key, 4)
    params = init_decoder_params(pkey, dec_vocab_size, max_word_len, n_dec,
                                 d_model, d_ff, n_head)

    # One encoder output per decoder layer (the forward zips over them).
    enc_outputs = [jax.random.normal(k, (B, Lk, d_model), jnp.float32)
                   for k in jax.random.split(ekey, n_dec)]

    dec_input = jax.random.randint(dkey, (B, Lq), 1, dec_vocab_size,
                                   dtype=jnp.int32)
    dec_input = dec_input.at[:, -1].set(PAD)          # exercise padding mask
    enc_input = jax.random.randint(ikey, (B, Lq), 1, dec_vocab_size,
                                   dtype=jnp.int32)
    enc_input = enc_input.at[:, -1].set(PAD)
    dec_pos = jnp.broadcast_to(jnp.arange(1, Lq + 1, dtype=jnp.int32)[None],
                               (B, Lq))
    dec_pos = jnp.where(dec_input == PAD, PAD, dec_pos)

    out = decoder_forward(params, enc_outputs, enc_input, dec_input, dec_pos,
                          n_head)
    out = jax.block_until_ready(out)
    assert out.shape == (B, Lq, d_model)
    assert bool(jnp.isfinite(out).all())
    print("KERNEL_OK")
</pallas_src>

<mosaic_0001>
module attributes {stable_mosaic.version = 11 : i64} {
  func.func @decoder_kernel(%arg0: i32, %arg1: i32, %arg2: memref<1x8x32xf32, #tpu.memory_space<vmem>>, %arg3: memref<1x1x8x32xbf16, #tpu.memory_space<vmem>>, %arg4: memref<1x1x8xf32, #tpu.memory_space<vmem>>, %arg5: memref<1x1x8xf32, #tpu.memory_space<vmem>>, %arg6: memref<1x32x96xbf16, #tpu.memory_space<vmem>>, %arg7: memref<1x32x32xbf16, #tpu.memory_space<vmem>>, %arg8: memref<1x3x32xf32, #tpu.memory_space<vmem>>, %arg9: memref<1x32x32xbf16, #tpu.memory_space<vmem>>, %arg10: memref<1x32x64xbf16, #tpu.memory_space<vmem>>, %arg11: memref<1x32x32xbf16, #tpu.memory_space<vmem>>, %arg12: memref<1x3x32xf32, #tpu.memory_space<vmem>>, %arg13: memref<1x32x64xbf16, #tpu.memory_space<vmem>>, %arg14: memref<1x1x64xf32, #tpu.memory_space<vmem>>, %arg15: memref<1x64x32xbf16, #tpu.memory_space<vmem>>, %arg16: memref<1x3x32xf32, #tpu.memory_space<vmem>>, %arg17: memref<1x8x32xf32, #tpu.memory_space<vmem>>, %arg18: memref<1x8x8xf32, #tpu.memory_space<vmem>>, %arg19: memref<1x8x8xf32, #tpu.memory_space<vmem>>) attributes {dimension_semantics = [#tpu.dimension_semantics<parallel>, #tpu.dimension_semantics<arbitrary>], iteration_bounds = array<i64: 2, 2>, scalar_prefetch = 0 : i64, scratch_operands = 2 : i64, tpu.core_type = #tpu.core_type<tc>, window_params = [{transform_indices = @transform_0, window_bounds = array<i64: 1, 8, 32>}, {transform_indices = @transform_1, window_bounds = array<i64: 1, 1, 8, 32>}, {transform_indices = @transform_2, window_bounds = array<i64: 1, 1, 8>}, {transform_indices = @transform_3, window_bounds = array<i64: 1, 1, 8>}, {transform_indices = @transform_4, window_bounds = array<i64: 1, 32, 96>}, {transform_indices = @transform_5, window_bounds = array<i64: 1, 32, 32>}, {transform_indices = @transform_6, window_bounds = array<i64: 1, 3, 32>}, {transform_indices = @transform_7, window_bounds = array<i64: 1, 32, 32>}, {transform_indices = @transform_8, window_bounds = array<i64: 1, 32, 64>}, {transform_indices = @transform_9, window_bounds = array<i64: 1, 32, 32>}, {transform_indices = @transform_10, window_bounds = array<i64: 1, 3, 32>}, {transform_indices = @transform_11, window_bounds = array<i64: 1, 32, 64>}, {transform_indices = @transform_12, window_bounds = array<i64: 1, 1, 64>}, {transform_indices = @transform_13, window_bounds = array<i64: 1, 64, 32>}, {transform_indices = @transform_14, window_bounds = array<i64: 1, 3, 32>}, {transform_indices = @transform_15, window_bounds = array<i64: 1, 8, 32>}]} {
    %c0_i32 = arith.constant 0 : i32
    %0 = arith.cmpi eq, %arg1, %c0_i32 : i32
    %1 = arith.extui %0 : i1 to i32
    %c0_i32_0 = arith.constant 0 : i32
    %2 = arith.cmpi ne, %1, %c0_i32_0 : i32
    scf.if %2 {
      %c0_81 = arith.constant 0 : index
      %c0_82 = arith.constant 0 : index
      %c0_83 = arith.constant 0 : index
      %234 = vector.load %arg2[%c0_81, %c0_82, %c0_83] : memref<1x8x32xf32, #tpu.memory_space<vmem>>, vector<1x8x32xf32>
      %235 = vector.shape_cast %234 : vector<1x8x32xf32> to vector<8x32xf32>
      %c0_84 = arith.constant 0 : index
      %c0_85 = arith.constant 0 : index
      %c0_86 = arith.constant 0 : index
      %236 = vector.load %arg17[%c0_84, %c0_85, %c0_86] : memref<1x8x32xf32, #tpu.memory_space<vmem>>, vector<1x8x32xf32>
      %237 = vector.shape_cast %236 : vector<1x8x32xf32> to vector<8x32xf32>
      %238 = vector.shape_cast %235 : vector<8x32xf32> to vector<1x8x32xf32>
      tpu.vector_store %arg17[%c0_84, %c0_85, %c0_86], %238 {strides = array<i32>} : memref<1x8x32xf32, #tpu.memory_space<vmem>>, vector<1x8x32xf32>,
      %239 = tpu.iota {dimensions = array<i32: 1>} : vector<8x8xi32>
      %240 = tpu.iota {dimensions = array<i32: 0>} : vector<8x8xi32>
      %241 = arith.cmpi sgt, %239, %240 : vector<8x8xi32>
      %242 = arith.extui %241 : vector<8x8xi1> to vector<8x8xi32>
      %243 = arith.sitofp %242 : vector<8x8xi32> to vector<8x8xf32>
      %c0_87 = arith.constant 0 : index
      %c0_88 = arith.constant 0 : index
      %c0_89 = arith.constant 0 : index
      %244 = vector.load %arg4[%c0_87, %c0_88, %c0_89] : memref<1x1x8xf32, #tpu.memory_space<vmem>>, vector<1x1x8xf32>
      %245 = vector.shape_cast %244 : vector<1x1x8xf32> to vector<1x8xf32>
      %246 = vector.shape_cast %245 : vector<1x8xf32> to vector<1x1x8xf32>
      %247 = vector.shape_cast %243 : vector<8x8xf32> to vector<1x8x8xf32>
      %248 = vector.broadcast %246 : vector<1x1x8xf32> to vector<1x8x8xf32>
      %249 = arith.addf %248, %247 : vector<1x8x8xf32>
      %cst_90 = arith.constant 5.000000e-01 : f32
      %250 = vector.broadcast %cst_90 : f32 to vector<1x8x8xf32>
      %251 = arith.cmpf ogt, %249, %250 : vector<1x8x8xf32>
      %cst_91 = arith.constant -1.000000e+09 : f32
      %cst_92 = arith.constant 0.000000e+00 : f32
      %252 = vector.broadcast %cst_91 : f32 to vector<1x8x8xf32>
      %253 = vector.broadcast %cst_92 : f32 to vector<1x8x8xf32>
      %254 = arith.select %251, %252, %253 : vector<1x8x8xi1>, vector<1x8x8xf32>
      %c0_93 = arith.constant 0 : index
      %c0_94 = arith.constant 0 : index
      %c0_95 = arith.constant 0 : index
      %255 = vector.load %arg18[%c0_93, %c0_94, %c0_95] : memref<1x8x8xf32, #tpu.memory_space<vmem>>, vector<1x8x8xf32>
      tpu.vector_store %arg18[%c0_93, %c0_94, %c0_95], %254 {strides = array<i32>} : memref<1x8x8xf32, #tpu.memory_space<vmem>>, vector<1x8x8xf32>,
      %c0_96 = arith.constant 0 : index
      %c0_97 = arith.constant 0 : index
      %c0_98 = arith.constant 0 : index
      %256 = vector.load %arg5[%c0_96, %c0_97, %c0_98] : memref<1x1x8xf32, #tpu.memory_space<vmem>>, vector<1x1x8xf32>
      %257 = vector.shape_cast %256 : vector<1x1x8xf32> to vector<1x8xf32>
      %258 = vector.shape_cast %257 : vector<1x8xf32> to vector<1x1x8xf32>
      %cst_99 = arith.constant 5.000000e-01 : f32
      %259 = vector.broadcast %cst_99 : f32 to vector<1x1x8xf32>
      %260 = arith.cmpf ogt, %258, %259 : vector<1x1x8xf32>
      %cst_100 = arith.constant -1.000000e+09 : f32
      %cst_101 = arith.constant 0.000000e+00 : f32
      %261 = vector.broadcast %cst_100 : f32 to vector<1x1x8xf32>
      %262 = vector.broadcast %cst_101 : f32 to vector<1x1x8xf32>
      %263 = arith.select %260, %261, %262 : vector<1x1x8xi1>, vector<1x1x8xf32>
      %264 = vector.shape_cast %263 : vector<1x1x8xf32> to vector<1x1x8xf32>
      %265 = vector.broadcast %264 : vector<1x1x8xf32> to vector<1x8x8xf32>
      %c0_102 = arith.constant 0 : index
      %c0_103 = arith.constant 0 : index
      %c0_104 = arith.constant 0 : index
      %266 = vector.load %arg19[%c0_102, %c0_103, %c0_104] : memref<1x8x8xf32, #tpu.memory_space<vmem>>, vector<1x8x8xf32>
      tpu.vector_store %arg19[%c0_102, %c0_103, %c0_104], %265 {strides = array<i32>} : memref<1x8x8xf32, #tpu.memory_space<vmem>>, vector<1x8x8xf32>,
    } else {
    }
    %c0 = arith.constant 0 : index
    %c0_1 = arith.constant 0 : index
    %c0_2 = arith.constant 0 : index
    %3 = vector.load %arg17[%c0, %c0_1, %c0_2] : memref<1x8x32xf32, #tpu.memory_space<vmem>>, vector<1x8x32xf32>
    %4 = vector.shape_cast %3 : vector<1x8x32xf32> to vector<8x32xf32>
    %5 = arith.truncf %4 : vector<8x32xf32> to vector<8x32xbf16>
    %c0_3 = arith.constant 0 : index
    %c0_4 = arith.constant 0 : index
    %c0_5 = arith.constant 0 : index
    %6 = vector.load %arg6[%c0_3, %c0_4, %c0_5] : memref<1x32x96xbf16, #tpu.memory_space<vmem>>, vector<1x32x96xbf16>
    %7 = vector.shape_cast %6 : vector<1x32x96xbf16> to vector<32x96xbf16>
    %cst = arith.constant dense<0.000000e+00> : vector<8x96xf32>
    %8 = tpu.matmul %5, %7, %cst {dimension_numbers = #tpu.dot_dimension_numbers<[1], [0], [0], [1], [0, 0, 1, 1], [], []>} : vector<8x32xbf16>, vector<32x96xbf16>, vector<8x96xf32> -> vector<8x96xf32>
    %9 = vector.extract_strided_slice %8 {offsets = [0, 0], sizes = [8, 32], strides = [1, 1]} : vector<8x96xf32> to vector<8x32xf32>
    %10 = vector.shape_cast %9 : vector<8x32xf32> to vector<1x8x32xf32>
    %11 = vector.extract_strided_slice %8 {offsets = [0, 32], sizes = [8, 32], strides = [1, 1]} : vector<8x96xf32> to vector<8x32xf32>
    %12 = vector.shape_cast %11 : vector<8x32xf32> to vector<1x8x32xf32>
    %13 = vector.extract_strided_slice %8 {offsets = [0, 64], sizes = [8, 32], strides = [1, 1]} : vector<8x96xf32> to vector<8x32xf32>
    %14 = vector.shape_cast %13 : vector<8x32xf32> to vector<1x8x32xf32>
    %c0_6 = arith.constant 0 : index
    %c0_7 = arith.constant 0 : index
    %c0_8 = arith.constant 0 : index
    %15 = vector.load %arg8[%c0_6, %c0_7, %c0_8] : memref<1x3x32xf32, #tpu.memory_space<vmem>>, vector<1x3x32xf32>
    %16 = vector.shape_cast %15 : vector<1x3x32xf32> to vector<3x32xf32>
    %c0_9 = arith.constant 0 : index
    %c0_10 = arith.constant 0 : index
    %c0_11 = arith.constant 0 : index
    %17 = vector.load %arg7[%c0_9, %c0_10, %c0_11] : memref<1x32x32xbf16, #tpu.memory_space<vmem>>, vector<1x32x32xbf16>
    %18 = vector.shape_cast %17 : vector<1x32x32xbf16> to vector<32x32xbf16>
    %19 = vector.extract_strided_slice %16 {offsets = [0, 0], sizes = [1, 32], strides = [1, 1]} : vector<3x32xf32> to vector<1x32xf32>
    %20 = vector.extract_strided_slice %10 {offsets = [0, 0, 0], sizes = [1, 8, 8], strides = [1, 1, 1]} : vector<1x8x32xf32> to vector<1x8x8xf32>
    %21 = vector.extract_strided_slice %10 {offsets = [0, 0, 8], sizes = [1, 8, 8], strides = [1, 1, 1]} : vector<1x8x32xf32> to vector<1x8x8xf32>
    %22 = vector.extract_strided_slice %10 {offsets = [0, 0, 16], sizes = [1, 8, 8], strides = [1, 1, 1]} : vector<1x8x32xf32> to vector<1x8x8xf32>
    %23 = vector.extract_strided_slice %10 {offsets = [0, 0, 24], sizes = [1, 8, 8], strides = [1, 1, 1]} : vector<1x8x32xf32> to vector<1x8x8xf32>
    %24 = tpu.concatenate %20, %21, %22, %23 in 0 : vector<1x8x8xf32>, vector<1x8x8xf32>, vector<1x8x8xf32>, vector<1x8x8xf32> -> vector<4x8x8xf32>
    %25 = arith.truncf %24 : vector<4x8x8xf32> to vector<4x8x8xbf16>
    %26 = vector.extract_strided_slice %12 {offsets = [0, 0, 0], sizes = [1, 8, 8], strides = [1, 1, 1]} : vector<1x8x32xf32> to vector<1x8x8xf32>
    %27 = vector.extract_strided_slice %12 {offsets = [0, 0, 8], sizes = [1, 8, 8], strides = [1, 1, 1]} : vector<1x8x32xf32> to vector<1x8x8xf32>
    %28 = vector.extract_strided_slice %12 {offsets = [0, 0, 16], sizes = [1, 8, 8], strides = [1, 1, 1]} : vector<1x8x32xf32> to vector<1x8x8xf32>
    %29 = vector.extract_strided_slice %12 {offsets = [0, 0, 24], sizes = [1, 8, 8], strides = [1, 1, 1]} : vector<1x8x32xf32> to vector<1x8x8xf32>
    %30 = tpu.concatenate %26, %27, %28, %29 in 0 : vector<1x8x8xf32>, vector<1x8x8xf32>, vector<1x8x8xf32>, vector<1x8x8xf32> -> vector<4x8x8xf32>
    %31 = arith.truncf %30 : vector<4x8x8xf32> to vector<4x8x8xbf16>
    %32 = vector.extract_strided_slice %14 {offsets = [0, 0, 0], sizes = [1, 8, 8], strides = [1, 1, 1]} : vector<1x8x32xf32> to vector<1x8x8xf32>
    %33 = vector.extract_strided_slice %14 {offsets = [0, 0, 8], sizes = [1, 8, 8], strides = [1, 1, 1]} : vector<1x8x32xf32> to vector<1x8x8xf32>
    %34 = vector.extract_strided_slice %14 {offsets = [0, 0, 16], sizes = [1, 8, 8], strides = [1, 1, 1]} : vector<1x8x32xf32> to vector<1x8x8xf32>
    %35 = vector.extract_strided_slice %14 {offsets = [0, 0, 24], sizes = [1, 8, 8], strides = [1, 1, 1]} : vector<1x8x32xf32> to vector<1x8x8xf32>
    %36 = tpu.concatenate %32, %33, %34, %35 in 0 : vector<1x8x8xf32>, vector<1x8x8xf32>, vector<1x8x8xf32>, vector<1x8x8xf32> -> vector<4x8x8xf32>
    %37 = arith.truncf %36 : vector<4x8x8xf32> to vector<4x8x8xbf16>
    "tpu.trace_start"() <{level = 10 : i32, message = "bqd,bkd->bqk"}> : () -> ()
    %cst_12 = arith.constant dense<0.000000e+00> : vector<4x8x8xf32>
    %38 = tpu.matmul %25, %31, %cst_12 {dimension_numbers = #tpu.dot_dimension_numbers<[2], [2], [1], [1], [0, 0, 0, 1, 1, 1], [0], [0]>} : vector<4x8x8xbf16>, vector<4x8x8xbf16>, vector<4x8x8xf32> -> vector<4x8x8xf32>
    "tpu.trace_stop"() : () -> ()
    %cst_13 = arith.constant 0.353553385 : f32
    %39 = vector.broadcast %cst_13 : f32 to vector<4x8x8xf32>
    %40 = arith.mulf %38, %39 : vector<4x8x8xf32>
    %41 = vector.shape_cast %40 : vector<4x8x8xf32> to vector<4x1x8x8xf32>
    %c0_14 = arith.constant 0 : index
    %c0_15 = arith.constant 0 : index
    %c0_16 = arith.constant 0 : index
    %42 = vector.load %arg18[%c0_14, %c0_15, %c0_16] : memref<1x8x8xf32, #tpu.memory_space<vmem>>, vector<1x8x8xf32>
    %43 = vector.shape_cast %42 : vector<1x8x8xf32> to vector<1x1x8x8xf32>
    %44 = vector.broadcast %43 : vector<1x1x8x8xf32> to vector<4x1x8x8xf32>
    %45 = arith.addf %41, %44 : vector<4x1x8x8xf32>
    %46 = vector.shape_cast %45 : vector<4x1x8x8xf32> to vector<4x8x8xf32>
    %cst_17 = arith.constant dense<0xFF800000> : vector<4x8xf32>
    %47 = vector.multi_reduction <maximumf>, %46, %cst_17 [2] : vector<4x8x8xf32> to vector<4x8xf32>
    %48 = vector.shape_cast %47 : vector<4x8xf32> to vector<4x8x1xf32>
    %49 = vector.broadcast %48 : vector<4x8x1xf32> to vector<4x8x8xf32>
    %50 = arith.subf %46, %49 : vector<4x8x8xf32>
    %51 = math.exp %50 : vector<4x8x8xf32>
    %cst_18 = arith.constant dense<0.000000e+00> : vector<4x8xf32>
    %52 = vector.multi_reduction <add>, %51, %cst_18 [2] : vector<4x8x8xf32> to vector<4x8xf32>
    %53 = vector.shape_cast %52 : vector<4x8xf32> to vector<4x8x1xf32>
    %54 = tpu.reciprocal %53 {approx = true} : vector<4x8x1xf32> -> vector<4x8x1xf32>
    %55 = vector.broadcast %54 : vector<4x8x1xf32> to vector<4x8x8xf32>
    %56 = arith.mulf %51, %55 : vector<4x8x8xf32>
    %57 = arith.truncf %56 : vector<4x8x8xf32> to vector<4x8x8xbf16>
    "tpu.trace_start"() <{level = 10 : i32, message = "bqk,bkd->bqd"}> : () -> ()
    %cst_19 = arith.constant dense<0.000000e+00> : vector<4x8x8xf32>
    %58 = tpu.matmul %57, %37, %cst_19 {dimension_numbers = #tpu.dot_dimension_numbers<[2], [1], [1], [2], [0, 0, 0, 1, 1, 2], [0], [0]>} : vector<4x8x8xbf16>, vector<4x8x8xbf16>, vector<4x8x8xf32> -> vector<4x8x8xf32>
    "tpu.trace_stop"() : () -> ()
    %59 = vector.extract_strided_slice %58 {offsets = [0, 0, 0], sizes = [1, 8, 8], strides = [1, 1, 1]} : vector<4x8x8xf32> to vector<1x8x8xf32>
    %60 = vector.extract_strided_slice %58 {offsets = [1, 0, 0], sizes = [1, 8, 8], strides = [1, 1, 1]} : vector<4x8x8xf32> to vector<1x8x8xf32>
    %61 = vector.extract_strided_slice %58 {offsets = [2, 0, 0], sizes = [1, 8, 8], strides = [1, 1, 1]} : vector<4x8x8xf32> to vector<1x8x8xf32>
    %62 = vector.extract_strided_slice %58 {offsets = [3, 0, 0], sizes = [1, 8, 8], strides = [1, 1, 1]} : vector<4x8x8xf32> to vector<1x8x8xf32>
    %63 = tpu.concatenate %59, %60, %61, %62 in 2 : vector<1x8x8xf32>, vector<1x8x8xf32>, vector<1x8x8xf32>, vector<1x8x8xf32> -> vector<1x8x32xf32>
    %64 = vector.shape_cast %63 : vector<1x8x32xf32> to vector<8x32xf32>
    %65 = arith.truncf %64 : vector<8x32xf32> to vector<8x32xbf16>
    %cst_20 = arith.constant dense<0.000000e+00> : vector<8x32xf32>
    %66 = tpu.matmul %65, %18, %cst_20 {dimension_numbers = #tpu.dot_dimension_numbers<[1], [0], [0], [1], [0, 0, 1, 1], [], []>} : vector<8x32xbf16>, vector<32x32xbf16>, vector<8x32xf32> -> vector<8x32xf32>
    %67 = vector.broadcast %19 : vector<1x32xf32> to vector<8x32xf32>
    %68 = arith.addf %66, %67 : vector<8x32xf32>
    %69 = vector.extract_strided_slice %16 {offsets = [1, 0], sizes = [1, 32], strides = [1, 1]} : vector<3x32xf32> to vector<1x32xf32>
    %70 = vector.extract_strided_slice %16 {offsets = [2, 0], sizes = [1, 32], strides = [1, 1]} : vector<3x32xf32> to vector<1x32xf32>
    %71 = arith.addf %68, %4 : vector<8x32xf32>
    %cst_21 = arith.constant dense<0.000000e+00> : vector<8xf32>
    %72 = vector.multi_reduction <add>, %71, %cst_21 [1] : vector<8x32xf32> to vector<8xf32>
    %73 = vector.shape_cast %72 : vector<8xf32> to vector<8x1xf32>
    %cst_22 = arith.constant 3.200000e+01 : f32
    %74 = vector.broadcast %cst_22 : f32 to vector<8x1xf32>
    %75 = arith.divf %73, %74 : vector<8x1xf32>
    %76 = vector.broadcast %75 : vector<8x1xf32> to vector<8x32xf32>
    %77 = arith.subf %71, %76 : vector<8x32xf32>
    %78 = arith.mulf %77, %77 : vector<8x32xf32>
    %cst_23 = arith.constant dense<0.000000e+00> : vector<8xf32>
    %79 = vector.multi_reduction <add>, %78, %cst_23 [1] : vector<8x32xf32> to vector<8xf32>
    %80 = vector.shape_cast %79 : vector<8xf32> to vector<8x1xf32>
    %cst_24 = arith.constant 3.200000e+01 : f32
    %81 = vector.broadcast %cst_24 : f32 to vector<8x1xf32>
    %82 = arith.divf %80, %81 : vector<8x1xf32>
    %83 = vector.broadcast %75 : vector<8x1xf32> to vector<8x32xf32>
    %84 = arith.subf %71, %83 : vector<8x32xf32>
    %cst_25 = arith.constant 9.99999997E-7 : f32
    %85 = vector.broadcast %cst_25 : f32 to vector<8x1xf32>
    %86 = arith.addf %82, %85 : vector<8x1xf32>
    %87 = math.rsqrt %86 : vector<8x1xf32>
    %88 = vector.broadcast %87 : vector<8x1xf32> to vector<8x32xf32>
    %89 = arith.mulf %84, %88 : vector<8x32xf32>
    %90 = vector.broadcast %69 : vector<1x32xf32> to vector<8x32xf32>
    %91 = arith.mulf %89, %90 : vector<8x32xf32>
    %92 = vector.broadcast %70 : vector<1x32xf32> to vector<8x32xf32>
    %93 = arith.addf %91, %92 : vector<8x32xf32>
    %c0_26 = arith.constant 0 : index
    %c0_27 = arith.constant 0 : index
    %c0_28 = arith.constant 0 : index
    %c0_29 = arith.constant 0 : index
    %94 = vector.load %arg3[%c0_26, %c0_27, %c0_28, %c0_29] : memref<1x1x8x32xbf16, #tpu.memory_space<vmem>>, vector<1x1x8x32xbf16>
    %95 = vector.shape_cast %94 : vector<1x1x8x32xbf16> to vector<8x32xbf16>
    %96 = arith.truncf %93 : vector<8x32xf32> to vector<8x32xbf16>
    %c0_30 = arith.constant 0 : index
    %c0_31 = arith.constant 0 : index
    %c0_32 = arith.constant 0 : index
    %97 = vector.load %arg9[%c0_30, %c0_31, %c0_32] : memref<1x32x32xbf16, #tpu.memory_space<vmem>>, vector<1x32x32xbf16>
    %98 = vector.shape_cast %97 : vector<1x32x32xbf16> to vector<32x32xbf16>
    %cst_33 = arith.constant dense<0.000000e+00> : vector<8x32xf32>
    %99 = tpu.matmul %96, %98, %cst_33 {dimension_numbers = #tpu.dot_dimension_numbers<[1], [0], [0], [1], [0, 0, 1, 1], [], []>} : vector<8x32xbf16>, vector<32x32xbf16>, vector<8x32xf32> -> vector<8x32xf32>
    %100 = vector.shape_cast %99 : vector<8x32xf32> to vector<1x8x32xf32>
    %c0_34 = arith.constant 0 : index
    %c0_35 = arith.constant 0 : index
    %c0_36 = arith.constant 0 : index
    %101 = vector.load %arg10[%c0_34, %c0_35, %c0_36] : memref<1x32x64xbf16, #tpu.memory_space<vmem>>, vector<1x32x64xbf16>
    %102 = vector.shape_cast %101 : vector<1x32x64xbf16> to vector<32x64xbf16>
    %cst_37 = arith.constant dense<0.000000e+00> : vector<8x64xf32>
    %103 = tpu.matmul %95, %102, %cst_37 {dimension_numbers = #tpu.dot_dimension_numbers<[1], [0], [0], [1], [0, 0, 1, 1], [], []>} : vector<8x32xbf16>, vector<32x64xbf16>, vector<8x64xf32> -> vector<8x64xf32>
    %104 = vector.extract_strided_slice %103 {offsets = [0, 0], sizes = [8, 32], strides = [1, 1]} : vector<8x64xf32> to vector<8x32xf32>
    %105 = vector.shape_cast %104 : vector<8x32xf32> to vector<1x8x32xf32>
    %106 = vector.extract_strided_slice %103 {offsets = [0, 32], sizes = [8, 32], strides = [1, 1]} : vector<8x64xf32> to vector<8x32xf32>
    %107 = vector.shape_cast %106 : vector<8x32xf32> to vector<1x8x32xf32>
    %c0_38 = arith.constant 0 : index
    %c0_39 = arith.constant 0 : index
    %c0_40 = arith.constant 0 : index
    %108 = vector.load %arg12[%c0_38, %c0_39, %c0_40] : memref<1x3x32xf32, #tpu.memory_space<vmem>>, vector<1x3x32xf32>
    %109 = vector.shape_cast %108 : vector<1x3x32xf32> to vector<3x32xf32>
    %c0_41 = arith.constant 0 : index
    %c0_42 = arith.constant 0 : index
    %c0_43 = arith.constant 0 : index
    %110 = vector.load %arg11[%c0_41, %c0_42, %c0_43] : memref<1x32x32xbf16, #tpu.memory_space<vmem>>, vector<1x32x32xbf16>
    %111 = vector.shape_cast %110 : vector<1x32x32xbf16> to vector<32x32xbf16>
    %112 = vector.extract_strided_slice %109 {offsets = [0, 0], sizes = [1, 32], strides = [1, 1]} : vector<3x32xf32> to vector<1x32xf32>
    %113 = vector.extract_strided_slice %100 {offsets = [0, 0, 0], sizes = [1, 8, 8], strides = [1, 1, 1]} : vector<1x8x32xf32> to vector<1x8x8xf32>
    %114 = vector.extract_strided_slice %100 {offsets = [0, 0, 8], sizes = [1, 8, 8], strides = [1, 1, 1]} : vector<1x8x32xf32> to vector<1x8x8xf32>
    %115 = vector.extract_strided_slice %100 {offsets = [0, 0, 16], sizes = [1, 8, 8], strides = [1, 1, 1]} : vector<1x8x32xf32> to vector<1x8x8xf32>
    %116 = vector.extract_strided_slice %100 {offsets = [0, 0, 24], sizes = [1, 8, 8], strides = [1, 1, 1]} : vector<1x8x32xf32> to vector<1x8x8xf32>
    %117 = tpu.concatenate %113, %114, %115, %116 in 0 : vector<1x8x8xf32>, vector<1x8x8xf32>, vector<1x8x8xf32>, vector<1x8x8xf32> -> vector<4x8x8xf32>
    %118 = arith.truncf %117 : vector<4x8x8xf32> to vector<4x8x8xbf16>
    %119 = vector.extract_strided_slice %105 {offsets = [0, 0, 0], sizes = [1, 8, 8], strides = [1, 1, 1]} : vector<1x8x32xf32> to vector<1x8x8xf32>
    %120 = vector.extract_strided_slice %105 {offsets = [0, 0, 8], sizes = [1, 8, 8], strides = [1, 1, 1]} : vector<1x8x32xf32> to vector<1x8x8xf32>
    %121 = vector.extract_strided_slice %105 {offsets = [0, 0, 16], sizes = [1, 8, 8], strides = [1, 1, 1]} : vector<1x8x32xf32> to vector<1x8x8xf32>
    %122 = vector.extract_strided_slice %105 {offsets = [0, 0, 24], sizes = [1, 8, 8], strides = [1, 1, 1]} : vector<1x8x32xf32> to vector<1x8x8xf32>
    %123 = tpu.concatenate %119, %120, %121, %122 in 0 : vector<1x8x8xf32>, vector<1x8x8xf32>, vector<1x8x8xf32>, vector<1x8x8xf32> -> vector<4x8x8xf32>
    %124 = arith.truncf %123 : vector<4x8x8xf32> to vector<4x8x8xbf16>
    %125 = vector.extract_strided_slice %107 {offsets = [0, 0, 0], sizes = [1, 8, 8], strides = [1, 1, 1]} : vector<1x8x32xf32> to vector<1x8x8xf32>
    %126 = vector.extract_strided_slice %107 {offsets = [0, 0, 8], sizes = [1, 8, 8], strides = [1, 1, 1]} : vector<1x8x32xf32> to vector<1x8x8xf32>
    %127 = vector.extract_strided_slice %107 {offsets = [0, 0, 16], sizes = [1, 8, 8], strides = [1, 1, 1]} : vector<1x8x32xf32> to vector<1x8x8xf32>
    %128 = vector.extract_strided_slice %107 {offsets = [0, 0, 24], sizes = [1, 8, 8], strides = [1, 1, 1]} : vector<1x8x32xf32> to vector<1x8x8xf32>
    %129 = tpu.concatenate %125, %126, %127, %128 in 0 : vector<1x8x8xf32>, vector<1x8x8xf32>, vector<1x8x8xf32>, vector<1x8x8xf32> -> vector<4x8x8xf32>
    %130 = arith.truncf %129 : vector<4x8x8xf32> to vector<4x8x8xbf16>
    "tpu.trace_start"() <{level = 10 : i32, message = "bqd,bkd->bqk"}> : () -> ()
    %cst_44 = arith.constant dense<0.000000e+00> : vector<4x8x8xf32>
    %131 = tpu.matmul %118, %124, %cst_44 {dimension_numbers = #tpu.dot_dimension_numbers<[2], [2], [1], [1], [0, 0, 0, 1, 1, 1], [0], [0]>} : vector<4x8x8xbf16>, vector<4x8x8xbf16>, vector<4x8x8xf32> -> vector<4x8x8xf32>
    "tpu.trace_stop"() : () -> ()
    %cst_45 = arith.constant 0.353553385 : f32
    %132 = vector.broadcast %cst_45 : f32 to vector<4x8x8xf32>
    %133 = arith.mulf %131, %132 : vector<4x8x8xf32>
    %134 = vector.shape_cast %133 : vector<4x8x8xf32> to vector<4x1x8x8xf32>
    %c0_46 = arith.constant 0 : index
    %c0_47 = arith.constant 0 : index
    %c0_48 = arith.constant 0 : index
    %135 = vector.load %arg19[%c0_46, %c0_47, %c0_48] : memref<1x8x8xf32, #tpu.memory_space<vmem>>, vector<1x8x8xf32>
    %136 = vector.shape_cast %135 : vector<1x8x8xf32> to vector<1x1x8x8xf32>
    %137 = vector.broadcast %136 : vector<1x1x8x8xf32> to vector<4x1x8x8xf32>
    %138 = arith.addf %134, %137 : vector<4x1x8x8xf32>
    %139 = vector.shape_cast %138 : vector<4x1x8x8xf32> to vector<4x8x8xf32>
    %cst_49 = arith.constant dense<0xFF800000> : vector<4x8xf32>
    %140 = vector.multi_reduction <maximumf>, %139, %cst_49 [2] : vector<4x8x8xf32> to vector<4x8xf32>
    %141 = vector.shape_cast %140 : vector<4x8xf32> to vector<4x8x1xf32>
    %142 = vector.broadcast %141 : vector<4x8x1xf32> to vector<4x8x8xf32>
    %143 = arith.subf %139, %142 : vector<4x8x8xf32>
    %144 = math.exp %143 : vector<4x8x8xf32>
    %cst_50 = arith.constant dense<0.000000e+00> : vector<4x8xf32>
    %145 = vector.multi_reduction <add>, %144, %cst_50 [2] : vector<4x8x8xf32> to vector<4x8xf32>
    %146 = vector.shape_cast %145 : vector<4x8xf32> to vector<4x8x1xf32>
    %147 = tpu.reciprocal %146 {approx = true} : vector<4x8x1xf32> -> vector<4x8x1xf32>
    %148 = vector.broadcast %147 : vector<4x8x1xf32> to vector<4x8x8xf32>
    %149 = arith.mulf %144, %148 : vector<4x8x8xf32>
    %150 = arith.truncf %149 : vector<4x8x8xf32> to vector<4x8x8xbf16>
    "tpu.trace_start"() <{level = 10 : i32, message = "bqk,bkd->bqd"}> : () -> ()
    %cst_51 = arith.constant dense<0.000000e+00> : vector<4x8x8xf32>
    %151 = tpu.matmul %150, %130, %cst_51 {dimension_numbers = #tpu.dot_dimension_numbers<[2], [1], [1], [2], [0, 0, 0, 1, 1, 2], [0], [0]>} : vector<4x8x8xbf16>, vector<4x8x8xbf16>, vector<4x8x8xf32> -> vector<4x8x8xf32>
    "tpu.trace_stop"() : () -> ()
    %152 = vector.extract_strided_slice %151 {offsets = [0, 0, 0], sizes = [1, 8, 8], strides = [1, 1, 1]} : vector<4x8x8xf32> to vector<1x8x8xf32>
    %153 = vector.extract_strided_slice %151 {offsets = [1, 0, 0], sizes = [1, 8, 8], strides = [1, 1, 1]} : vector<4x8x8xf32> to vector<1x8x8xf32>
    %154 = vector.extract_strided_slice %151 {offsets = [2, 0, 0], sizes = [1, 8, 8], strides = [1, 1, 1]} : vector<4x8x8xf32> to vector<1x8x8xf32>
    %155 = vector.extract_strided_slice %151 {offsets = [3, 0, 0], sizes = [1, 8, 8], strides = [1, 1, 1]} : vector<4x8x8xf32> to vector<1x8x8xf32>
    %156 = tpu.concatenate %152, %153, %154, %155 in 2 : vector<1x8x8xf32>, vector<1x8x8xf32>, vector<1x8x8xf32>, vector<1x8x8xf32> -> vector<1x8x32xf32>
    %157 = vector.shape_cast %156 : vector<1x8x32xf32> to vector<8x32xf32>
    %158 = arith.truncf %157 : vector<8x32xf32> to vector<8x32xbf16>
    %cst_52 = arith.constant dense<0.000000e+00> : vector<8x32xf32>
    %159 = tpu.matmul %158, %111, %cst_52 {dimension_numbers = #tpu.dot_dimension_numbers<[1], [0], [0], [1], [0, 0, 1, 1], [], []>} : vector<8x32xbf16>, vector<32x32xbf16>, vector<8x32xf32> -> vector<8x32xf32>
    %160 = vector.broadcast %112 : vector<1x32xf32> to vector<8x32xf32>
    %161 = arith.addf %159, %160 : vector<8x32xf32>
    %162 = vector.extract_strided_slice %109 {offsets = [1, 0], sizes = [1, 32], strides = [1, 1]} : vector<3x32xf32> to vector<1x32xf32>
    %163 = vector.extract_strided_slice %109 {offsets = [2, 0], sizes = [1, 32], strides = [1, 1]} : vector<3x32xf32> to vector<1x32xf32>
    %164 = arith.addf %161, %93 : vector<8x32xf32>
    %cst_53 = arith.constant dense<0.000000e+00> : vector<8xf32>
    %165 = vector.multi_reduction <add>, %164, %cst_53 [1] : vector<8x32xf32> to vector<8xf32>
    %166 = vector.shape_cast %165 : vector<8xf32> to vector<8x1xf32>
    %cst_54 = arith.constant 3.200000e+01 : f32
    %167 = vector.broadcast %cst_54 : f32 to vector<8x1xf32>
    %168 = arith.divf %166, %167 : vector<8x1xf32>
    %169 = vector.broadcast %168 : vector<8x1xf32> to vector<8x32xf32>
    %170 = arith.subf %164, %169 : vector<8x32xf32>
    %171 = arith.mulf %170, %170 : vector<8x32xf32>
    %cst_55 = arith.constant dense<0.000000e+00> : vector<8xf32>
    %172 = vector.multi_reduction <add>, %171, %cst_55 [1] : vector<8x32xf32> to vector<8xf32>
    %173 = vector.shape_cast %172 : vector<8xf32> to vector<8x1xf32>
    %cst_56 = arith.constant 3.200000e+01 : f32
    %174 = vector.broadcast %cst_56 : f32 to vector<8x1xf32>
    %175 = arith.divf %173, %174 : vector<8x1xf32>
    %176 = vector.broadcast %168 : vector<8x1xf32> to vector<8x32xf32>
    %177 = arith.subf %164, %176 : vector<8x32xf32>
    %cst_57 = arith.constant 9.99999997E-7 : f32
    %178 = vector.broadcast %cst_57 : f32 to vector<8x1xf32>
    %179 = arith.addf %175, %178 : vector<8x1xf32>
    %180 = math.rsqrt %179 : vector<8x1xf32>
    %181 = vector.broadcast %180 : vector<8x1xf32> to vector<8x32xf32>
    %182 = arith.mulf %177, %181 : vector<8x32xf32>
    %183 = vector.broadcast %162 : vector<1x32xf32> to vector<8x32xf32>
    %184 = arith.mulf %182, %183 : vector<8x32xf32>
    %185 = vector.broadcast %163 : vector<1x32xf32> to vector<8x32xf32>
    %186 = arith.addf %184, %185 : vector<8x32xf32>
    %187 = arith.truncf %186 : vector<8x32xf32> to vector<8x32xbf16>
    %c0_58 = arith.constant 0 : index
    %c0_59 = arith.constant 0 : index
    %c0_60 = arith.constant 0 : index
    %188 = vector.load %arg13[%c0_58, %c0_59, %c0_60] : memref<1x32x64xbf16, #tpu.memory_space<vmem>>, vector<1x32x64xbf16>
    %189 = vector.shape_cast %188 : vector<1x32x64xbf16> to vector<32x64xbf16>
    %cst_61 = arith.constant dense<0.000000e+00> : vector<8x64xf32>
    %190 = tpu.matmul %187, %189, %cst_61 {dimension_numbers = #tpu.dot_dimension_numbers<[1], [0], [0], [1], [0, 0, 1, 1], [], []>} : vector<8x32xbf16>, vector<32x64xbf16>, vector<8x64xf32> -> vector<8x64xf32>
    %c0_62 = arith.constant 0 : index
    %c0_63 = arith.constant 0 : index
    %c0_64 = arith.constant 0 : index
    %191 = vector.load %arg14[%c0_62, %c0_63, %c0_64] : memref<1x1x64xf32, #tpu.memory_space<vmem>>, vector<1x1x64xf32>
    %192 = vector.shape_cast %191 : vector<1x1x64xf32> to vector<1x64xf32>
    %193 = vector.broadcast %192 : vector<1x64xf32> to vector<8x64xf32>
    %194 = arith.addf %190, %193 : vector<8x64xf32>
    %cst_65 = arith.constant 0.000000e+00 : f32
    %195 = vector.broadcast %cst_65 : f32 to vector<8x64xf32>
    %196 = arith.maximumf %194, %195 : vector<8x64xf32>
    %197 = arith.truncf %196 : vector<8x64xf32> to vector<8x64xbf16>
    %c0_66 = arith.constant 0 : index
    %c0_67 = arith.constant 0 : index
    %c0_68 = arith.constant 0 : index
    %198 = vector.load %arg15[%c0_66, %c0_67, %c0_68] : memref<1x64x32xbf16, #tpu.memory_space<vmem>>, vector<1x64x32xbf16>
    %199 = vector.shape_cast %198 : vector<1x64x32xbf16> to vector<64x32xbf16>
    %cst_69 = arith.constant dense<0.000000e+00> : vector<8x32xf32>
    %200 = tpu.matmul %197, %199, %cst_69 {dimension_numbers = #tpu.dot_dimension_numbers<[1], [0], [0], [1], [0, 0, 1, 1], [], []>} : vector<8x64xbf16>, vector<64x32xbf16>, vector<8x32xf32> -> vector<8x32xf32>
    %c0_70 = arith.constant 0 : index
    %c0_71 = arith.constant 0 : index
    %c0_72 = arith.constant 0 : index
    %201 = vector.load %arg16[%c0_70, %c0_71, %c0_72] : memref<1x3x32xf32, #tpu.memory_space<vmem>>, vector<1x3x32xf32>
    %202 = vector.shape_cast %201 : vector<1x3x32xf32> to vector<3x32xf32>
    %203 = vector.extract_strided_slice %202 {offsets = [0, 0], sizes = [1, 32], strides = [1, 1]} : vector<3x32xf32> to vector<1x32xf32>
    %204 = vector.broadcast %203 : vector<1x32xf32> to vector<8x32xf32>
    %205 = arith.addf %200, %204 : vector<8x32xf32>
    %206 = vector.extract_strided_slice %202 {offsets = [1, 0], sizes = [1, 32], strides = [1, 1]} : vector<3x32xf32> to vector<1x32xf32>
    %207 = vector.extract_strided_slice %202 {offsets = [2, 0], sizes = [1, 32], strides = [1, 1]} : vector<3x32xf32> to vector<1x32xf32>
    %208 = arith.addf %205, %186 : vector<8x32xf32>
    %cst_73 = arith.constant dense<0.000000e+00> : vector<8xf32>
    %209 = vector.multi_reduction <add>, %208, %cst_73 [1] : vector<8x32xf32> to vector<8xf32>
    %210 = vector.shape_cast %209 : vector<8xf32> to vector<8x1xf32>
    %cst_74 = arith.constant 3.200000e+01 : f32
    %211 = vector.broadcast %cst_74 : f32 to vector<8x1xf32>
    %212 = arith.divf %210, %211 : vector<8x1xf32>
    %213 = vector.broadcast %212 : vector<8x1xf32> to vector<8x32xf32>
    %214 = arith.subf %208, %213 : vector<8x32xf32>
    %215 = arith.mulf %214, %214 : vector<8x32xf32>
    %cst_75 = arith.constant dense<0.000000e+00> : vector<8xf32>
    %216 = vector.multi_reduction <add>, %215, %cst_75 [1] : vector<8x32xf32> to vector<8xf32>
    %217 = vector.shape_cast %216 : vector<8xf32> to vector<8x1xf32>
    %cst_76 = arith.constant 3.200000e+01 : f32
    %218 = vector.broadcast %cst_76 : f32 to vector<8x1xf32>
    %219 = arith.divf %217, %218 : vector<8x1xf32>
    %220 = vector.broadcast %212 : vector<8x1xf32> to vector<8x32xf32>
    %221 = arith.subf %208, %220 : vector<8x32xf32>
    %cst_77 = arith.constant 9.99999997E-7 : f32
    %222 = vector.broadcast %cst_77 : f32 to vector<8x1xf32>
    %223 = arith.addf %219, %222 : vector<8x1xf32>
    %224 = math.rsqrt %223 : vector<8x1xf32>
    %225 = vector.broadcast %224 : vector<8x1xf32> to vector<8x32xf32>
    %226 = arith.mulf %221, %225 : vector<8x32xf32>
    %227 = vector.broadcast %206 : vector<1x32xf32> to vector<8x32xf32>
    %228 = arith.mulf %226, %227 : vector<8x32xf32>
    %229 = vector.broadcast %207 : vector<1x32xf32> to vector<8x32xf32>
    %230 = arith.addf %228, %229 : vector<8x32xf32>
    %c0_78 = arith.constant 0 : index
    %c0_79 = arith.constant 0 : index
    %c0_80 = arith.constant 0 : index
    %231 = vector.load %arg17[%c0_78, %c0_79, %c0_80] : memref<1x8x32xf32, #tpu.memory_space<vmem>>, vector<1x8x32xf32>
    %232 = vector.shape_cast %231 : vector<1x8x32xf32> to vector<8x32xf32>
    %233 = vector.shape_cast %230 : vector<8x32xf32> to vector<1x8x32xf32>
    tpu.vector_store %arg17[%c0_78, %c0_79, %c0_80], %233 {strides = array<i32>} : memref<1x8x32xf32, #tpu.memory_space<vmem>>, vector<1x8x32xf32>,
    return
  }
  func.func @transform_0(%arg0: i32, %arg1: i32) -> (i32, i32, i32) {
    %c0_i32 = arith.constant 0 : i32
    %c0_i32_0 = arith.constant 0 : i32
    %c0_i32_1 = arith.constant 0 : i32
    return %arg0, %c0_i32, %c0_i32_0 : i32, i32, i32
  }
  func.func @transform_1(%arg0: i32, %arg1: i32) -> (i32, i32, i32, i32) {
    %c0_i32 = arith.constant 0 : i32
    %c0_i32_0 = arith.constant 0 : i32
    %c0_i32_1 = arith.constant 0 : i32
    return %arg1, %arg0, %c0_i32, %c0_i32_0 : i32, i32, i32, i32
  }
  func.func @transform_2(%arg0: i32, %arg1: i32) -> (i32, i32, i32) {
    %c0_i32 = arith.constant 0 : i32
    %c0_i32_0 = arith.constant 0 : i32
    %c0_i32_1 = arith.constant 0 : i32
    return %arg0, %c0_i32, %c0_i32_0 : i32, i32, i32
  }
  func.func @transform_3(%arg0: i32, %arg1: i32) -> (i32, i32, i32) {
    %c0_i32 = arith.constant 0 : i32
    %c0_i32_0 = arith.constant 0 : i32
    %c0_i32_1 = arith.constant 0 : i32
    return %arg0, %c0_i32, %c0_i32_0 : i32, i32, i32
  }
  func.func @transform_4(%arg0: i32, %arg1: i32) -> (i32, i32, i32) {
    %c0_i32 = arith.constant 0 : i32
    %c0_i32_0 = arith.constant 0 : i32
    %c0_i32_1 = arith.constant 0 : i32
    return %arg1, %c0_i32, %c0_i32_0 : i32, i32, i32
  }
  func.func @transform_5(%arg0: i32, %arg1: i32) -> (i32, i32, i32) {
    %c0_i32 = arith.constant 0 : i32
    %c0_i32_0 = arith.constant 0 : i32
    %c0_i32_1 = arith.constant 0 : i32
    return %arg1, %c0_i32, %c0_i32_0 : i32, i32, i32
  }
  func.func @transform_6(%arg0: i32, %arg1: i32) -> (i32, i32, i32) {
    %c0_i32 = arith.constant 0 : i32
    %c0_i32_0 = arith.constant 0 : i32
    %c0_i32_1 = arith.constant 0 : i32
    return %arg1, %c0_i32, %c0_i32_0 : i32, i32, i32
  }
  func.func @transform_7(%arg0: i32, %arg1: i32) -> (i32, i32, i32) {
    %c0_i32 = arith.constant 0 : i32
    %c0_i32_0 = arith.constant 0 : i32
    %c0_i32_1 = arith.constant 0 : i32
    return %arg1, %c0_i32, %c0_i32_0 : i32, i32, i32
  }
  func.func @transform_8(%arg0: i32, %arg1: i32) -> (i32, i32, i32) {
    %c0_i32 = arith.constant 0 : i32
    %c0_i32_0 = arith.constant 0 : i32
    %c0_i32_1 = arith.constant 0 : i32
    return %arg1, %c0_i32, %c0_i32_0 : i32, i32, i32
  }
  func.func @transform_9(%arg0: i32, %arg1: i32) -> (i32, i32, i32) {
    %c0_i32 = arith.constant 0 : i32
    %c0_i32_0 = arith.constant 0 : i32
    %c0_i32_1 = arith.constant 0 : i32
    return %arg1, %c0_i32, %c0_i32_0 : i32, i32, i32
  }
  func.func @transform_10(%arg0: i32, %arg1: i32) -> (i32, i32, i32) {
    %c0_i32 = arith.constant 0 : i32
    %c0_i32_0 = arith.constant 0 : i32
    %c0_i32_1 = arith.constant 0 : i32
    return %arg1, %c0_i32, %c0_i32_0 : i32, i32, i32
  }
  func.func @transform_11(%arg0: i32, %arg1: i32) -> (i32, i32, i32) {
    %c0_i32 = arith.constant 0 : i32
    %c0_i32_0 = arith.constant 0 : i32
    %c0_i32_1 = arith.constant 0 : i32
    return %arg1, %c0_i32, %c0_i32_0 : i32, i32, i32
  }
  func.func @transform_12(%arg0: i32, %arg1: i32) -> (i32, i32, i32) {
    %c0_i32 = arith.constant 0 : i32
    %c0_i32_0 = arith.constant 0 : i32
    %c0_i32_1 = arith.constant 0 : i32
    return %arg1, %c0_i32, %c0_i32_0 : i32, i32, i32
  }
  func.func @transform_13(%arg0: i32, %arg1: i32) -> (i32, i32, i32) {
    %c0_i32 = arith.constant 0 : i32
    %c0_i32_0 = arith.constant 0 : i32
    %c0_i32_1 = arith.constant 0 : i32
    return %arg1, %c0_i32, %c0_i32_0 : i32, i32, i32
  }
  func.func @transform_14(%arg0: i32, %arg1: i32) -> (i32, i32, i32) {
    %c0_i32 = arith.constant 0 : i32
    %c0_i32_0 = arith.constant 0 : i32
    %c0_i32_1 = arith.constant 0 : i32
    return %arg1, %c0_i32, %c0_i32_0 : i32, i32, i32
  }
  func.func @transform_15(%arg0: i32, %arg1: i32) -> (i32, i32, i32) {
    %c0_i32 = arith.constant 0 : i32
    %c0_i32_0 = arith.constant 0 : i32
    %c0_i32_1 = arith.constant 0 : i32
    return %arg0, %c0_i32, %c0_i32_0 : i32, i32, i32
  }
}

</mosaic_0001>

<bundles_post_ra>
// kernel: tpu_custom_call.1
= control target key start
LH: loop header
LB: loop body
LE: loop exit
PB: predicated region body
PF: predicated region fallthrough
CT: control target
= control target key end

     0   :  { %s4465_s0 = inlined_call_operand.hbm [shape: f32[2,8,32], index: 0, kind: input, shape index: {}]   ;;  %s4466_s1 = inlined_call_operand.hbm [shape: bf16[2,2,8,32], index: 1, kind: input, shape index: {}]   ;;  %s4467_s2 = inlined_call_operand.hbm [shape: f32[2,1,8], index: 2, kind: input, shape index: {}]   ;;  %s4468_s3 = inlined_call_operand.hbm [shape: f32[2,1,8], index: 3, kind: input, shape index: {}]   ;;  %s4469_s4 = inlined_call_operand.vmem [shape: bf16[2,32,96], index: 4, kind: input, shape index: {}]   ;;  %s4470_s5 = inlined_call_operand.vmem [shape: bf16[2,32,32], index: 5, kind: input, shape index: {}]   ;;  %s4471_s6 = inlined_call_operand.vmem [shape: f32[2,3,32], index: 6, kind: input, shape index: {}]   ;;  %s4472_s7 = inlined_call_operand.vmem [shape: bf16[2,32,32], index: 7, kind: input, shape index: {}]   ;;  %s4473_s8 = inlined_call_operand.vmem [shape: bf16[2,32,64], index: 8, kind: input, shape index: {}]   ;;  %s4474_s9 = inlined_call_operand.hbm [shape: bf16[2,32,32], index: 9, kind: input, shape index: {}]   ;;  %s4475_s10 = inlined_call_operand.vmem [shape: f32[2,3,32], index: 10, kind: input, shape index: {}]   ;;  %s4476_s11 = inlined_call_operand.hbm [shape: bf16[2,32,64], index: 11, kind: input, shape index: {}]   ;;  %s4477_s12 = inlined_call_operand.hbm [shape: f32[2,1,64], index: 12, kind: input, shape index: {}]   ;;  %s4478_s13 = inlined_call_operand.vmem [shape: bf16[2,64,32], index: 13, kind: input, shape index: {}]   ;;  %s4479_s14 = inlined_call_operand.vmem [shape: f32[2,3,32], index: 14, kind: input, shape index: {}]   ;;  %s4480_s15 = inlined_call_operand.hbm [shape: f32[2,8,32], index: 15, kind: output, shape index: {}]  }
   0x1   :  { %4517 = sst [smem:[#allocation46_spill]] %s4465_s0 }
   0x2   :  { %4518 = sst [smem:[#allocation47_spill]] %s4466_s1 }
   0x3   :  { %4519 = sst [smem:[#allocation48_spill]] %s4467_s2 }
   0x4   :  { %4520 = sst [smem:[#allocation49_spill]] %s4468_s3 }
   0x5   :  { %4521 = sst [smem:[#allocation50_spill]] %s4469_s4 }
   0x6   :  { %4522 = sst [smem:[#allocation51_spill]] %s4470_s5 }
   0x7   :  { %4523 = sst [smem:[#allocation52_spill]] %s4471_s6 }
   0x8   :  { %4524 = sst [smem:[#allocation53_spill]] %s4472_s7 }
   0x9   :  { %4525 = sst [smem:[#allocation54_spill]] %s4473_s8 }
   0xa   :  { %4526 = sst [smem:[#allocation55_spill]] %s4474_s9 }
   0xb   :  { %4527 = sst [smem:[#allocation56_spill]] %s4475_s10 }
   0xc   :  { %4528 = sst [smem:[#allocation57_spill]] %s4476_s11 }
   0xd   :  { %4529 = sst [smem:[#allocation58_spill]] %s4477_s12 }
   0xe   :  { %4530 = sst [smem:[#allocation59_spill]] %s4478_s13 }
   0xf   :  { %4531 = sst [smem:[#allocation60_spill]] %s4479_s14 }
  0x10   :  { %4532 = sst [smem:[#allocation61_spill]] %s4480_s15 }
  0x11   :  { %20 = vsyncpa [#allocation5], 0 }
  0x12   :  { %22 = vsyncpa [#allocation5 + $0x1], 0 }
  0x13   :  { %23 = vsyncpa [#allocation8], 0 }
  0x14   :  { %25 = vsyncpa [#allocation8 + $0x1], 0 }
  0x15   :  { %26 = vsyncpa [#allocation11], 0 }
  0x16   :  { %28 = vsyncpa [#allocation11 + $0x1], 0 }
  0x17   :  { %29 = vsyncpa [#allocation14], 0 }
  0x18   :  { %31 = vsyncpa [#allocation14 + $0x1], 0 }
  0x19   :  { %32 = vsyncpa [#allocation6], 0 }
  0x1a   :  { %34 = vsyncpa [#allocation6 + $0x1], 0  ;;  %s3719_s18 = smov 0   ;;  %s3721_s19 = smov 0  }
  0x1b   :  { %s3723_s20 = smov 0   ;;  %s3725_s21 = smov 0  }
  0x1c   :  { %s3727_s22 = smov 0   ;;  %s3729_s23 = smov 0  }
  0x1d   :  { %s3731_s24 = smov 0   ;;  %s3733_s25 = smov 0  }
  0x1e   :  { %s3735_s26 = smov 0   ;;  %s3737_s27 = smov 0  }
  0x1f   :  { %s3739_s28 = smov 0   ;;  %s3741_s29 = smov 0  }
  0x20   :  { %s3743_s30 = smov 0   ;;  %s3745_s16 = smov 0  }
  0x21 LB: > { %4533 = sst [smem:[#allocation24_spill]] %s3568_s19  ;;  %s3788_s17 = sadd.s32 4294967295, %s3616_s16   ;;  %s3616_s16 = sphi %s3745_s16, %s40_s16   ;;  %s3612_s30 = sphi %s3743_s30, %s4636_s30   ;;  %s3608_s29 = sphi %s3741_s29, %s4635_s29   ;;  %s3604_s28 = sphi %s3739_s28, %s4634_s28   ;;  %s3600_s27 = sphi %s3737_s27, %s4633_s27   ;;  %s3596_s26 = sphi %s3735_s26, %s4632_s26   ;;  %s3592_s25 = sphi %s3733_s25, %s4631_s25   ;;  %s3588_s24 = sphi %s3731_s24, %s4630_s24   ;;  %s3584_s23 = sphi %s3729_s23, %s4629_s23   ;;  %s3580_s22 = sphi %s3727_s22, %s4628_s22   ;;  %s3576_s21 = sphi %s3725_s21, %s4627_s21   ;;  %s3572_s20 = sphi %s3723_s20, %s4626_s20   ;;  %s3568_s19 = sphi %s3721_s19, %s4638_s19   ;;  %s3564_s18 = sphi %s3719_s18, %s4624_s18  }
  0x22   : > { %4534 = sst [smem:[#allocation25_spill]] %s3572_s20  ;;  %s49_s15 = sadd.s32 1, %s3608_s29 }
  0x23   : > { %4535 = sst [smem:[#allocation26_spill]] %s3580_s22  ;;  %p50_p0 = scmp.ge.s32.totalorder %s49_s15, 2 }
  0x24   : > { %4536 = sst [smem:[#allocation27_spill]] %s3584_s23  ;;  %p4493_p1 = scmp.eq.s32.totalorder %s3616_s16, 0 }
  0x25   : > { %4537 = sst [smem:[#allocation28_spill]] %s3588_s24  ;;  %p4488_p2 = scmp.eq.s32.totalorder %s3788_s17, 0 }
  0x26   : > { %4538 = sst [smem:[#allocation29_spill]] %s3592_s25  ;;  %s4640_s15 = smov (%p50_p0, %s49_s15), 0 }
  0x27   : > { %4539 = sst [smem:[#allocation30_spill]] %s3596_s26  ;;  %s3799_s13 = ssub.s32 %s3608_s29, %s4640_s15 }
  0x28   : > { %4540 = sst [smem:[#allocation31_spill]] %s3600_s27  ;;  %s87_s14 = sadd.s32 1, %s3584_s23 }
  0x29   : > { %4541 = sst [smem:[#allocation32_spill]] %s3604_s28  ;;  %s52_s28 = sadd.s32 1, %s3612_s30 }
  0x2a   : > { %4542 = sst [smem:[#allocation33_spill]] %s3608_s29  ;;  %s4642_s28 = smov (!%p50_p0, %s52_s28), %s3612_s30 }
  0x2b   : > { %4543 = sst [smem:[#allocation34_spill]] %s3612_s30  ;;  %p54_p3 = scmp.ge.s32.totalorder %s4642_s28, 2 }
  0x2c   : > { %4544 = sst [smem:[#allocation35_spill]] %s3616_s16  ;;  %p94_p4 = scmp.ne.s32.totalorder %s3584_s23, %s3580_s22 }
  0x2d   : > { %4545 = sst [smem:[#allocation36_spill]] %s3788_s17  ;;  %p100_p5 = scmp.ne.s32.totalorder %s3580_s22, %s3576_s21 }
  0x2e   : > { %4546 = sst [smem:[#allocation37_spill]] %s4640_s15  ;;  %s4644_s28 = smov (%p54_p3, %s4642_s28), 0 }
  0x2f   : > { %4547 = sst [smem:[#allocation38_spill]] %s4644_s28  ;;  %p3810_p7 = por %p94_p4, %p4493_p1 }
  0x30   : > { %p3816_p8 = por %p100_p5, %p4488_p2  ;;  %s3822_s8 = ssub.s32 %s3612_s30, %s4644_s28 }
  0x31   : > { %p57_p9 = scmp.eq.s32.totalorder %s3822_s8, 0  ;;  %s84_s21 = sor.u32 %s3799_s13, %s3822_s8 }
  0x32   : > { %s4549_s15 = scalar_select %p3816_p8, 1, 0 }
  0x33   : > { %p85_p10 = scmp.eq.s32.totalorder %s84_s21, 0  ;;  %p4489_p11 = scmp.lt.s32.totalorder %s3616_s16, 4 }
  0x34   : > { %4550 = sst [smem:[#allocation39_spill]] %s4549_s15  ;;  %s3829_s7 = sand.u32 1, %s3616_s16  }
  0x35   : > { %s508_s6 = sand.u32 1, %s3584_s23   ;;  %s2738_s27 = sshll.u32 %s3608_s29, 1 }
  0x36   : > { %s3833_s5 = scalar_select %p85_p10, %s3584_s23, %s87_s14  }
  0x37   : > { %s2737_s4 = sshll.u32 %s508_s6, 2  ;;  %s515_s28 = sadd.s32 %s3612_s30, %s2738_s27 }
  0x38   : > { %4551 = sst [smem:[#allocation40_spill]] %s3833_s5  ;;  %s510_s15 = scalar_lea.vmem [#allocation7], %s2737_s4 }
  0x39   : > { %s519_s22 = sshll.u32 %s510_s15, 4  ;;  %s2739_s12 = sshll.u32 %s515_s28, 6  ;;  %s520_s22 = int_to_ptr.vmem [resolvable:$true] %s519_s22 }
  0x3a   : > { %s4552_s1 = sld [smem:[#allocation47_spill]]  ;;  %p3844_p12 = pnand %p4489_p11, %p3810_p7 }
  0x3b   : > { %p2749_p13 = scmp.ge.s32.totalorder %s3616_s16, 1  ;;  %p678_p0 = scmp.lt.s32.totalorder %s3616_s16, 5 }
  0x3c   : > { %s4490_s6 = scalar_lea.sflag [#allocation8], %s3829_s7  ;;  %p3258_p3 = pneg %p3844_p12 }
  0x3d   : > { %s3269_s4 = scalar_lea.vmem %s520_s22, 64  ;;  %s3618_s14 = smov [#allocation7]  }
  0x3e   : > { %p3270_p4 = scmp.ne.s32.totalorder %s520_s22, %s3269_s4  ;;  %s3274_s15 = sshll.u32 %s3618_s14, 4  ;;  %s3275_s15 = int_to_ptr.vmem [resolvable:$false] %s3274_s15 }
  0x3f   : > { %s3276_s0 = scalar_lea.vmem %s3275_s15, 128  ;;  %p3277_p6 = scmp.lt.s32.totalorder %s520_s22, %s3275_s15 }
  0x40   : > { %s517_s9 = scalar_lea.hbm %s4552_s1, %s2739_s12  ;;  %p3272_p5 = pnand %p3270_p4, %p3258_p3 }
  0x41   : > { %p3278_p2 = scmp.lt.s32.totalorder %s3276_s0, %s3269_s4 }
  0x42   : > { %p3273_p10 = pneg %p3272_p5 }
  0x43   : > { %p3279_p7 = por %p3278_p2, %p3277_p6 }
  0x45   : > { %p3280_p11 = pnand %p3279_p7, %p3273_p10 }
  0x47   : > { %3283 = shalt.err (!%p3280_p11)
}
  0x48   : > { %3055 = dma.hbm_to_vmem [thread:$0]  (!%p3844_p12), %s517_s9, 64, %s520_s22, %s4490_s6  }
  0x49   : > { %p3861_p2 = pnand %p2749_p13, %p678_p0  ;;  %s2732_s11 = sadd.s32 4294967294, %s3616_s16  }
  0x4a   : > { %s59_s12 = sadd.s32 1, %s3596_s26  ;;  %p66_p6 = scmp.ne.s32.totalorder %s3596_s26, %s3592_s25 }
  0x4b   : > { %s3872_s27 = scalar_select %p57_p9, %s3596_s26, %s59_s12  }
  0x4c   : > { %p68_p11 = por %p4493_p1, %p66_p6  ;;  %p72_p3 = scmp.ne.s32.totalorder %s3592_s25, %s3588_s24 }
  0x4d   : > { %4555 = sst [smem:[#allocation41_spill]] %s3872_s27  ;;  %p462_p4 = scmp.eq.s32.totalorder %s3788_s17, 3 }
  0x4e   : > { %p468_p5 = scmp.eq.s32.totalorder %s2732_s11, 3  ;;  %p4556_p10 = scmp.eq.s32.totalorder %s3788_s17, 0 }
  0x4f   : > { %s3886_s22 = sand.u32 1, %s3596_s26   ;;  %p3888_p13 = por %p462_p4, %p66_p6 }
  0x50   : > { %p3881_p12 = por %p4556_p10, %p72_p3  ;;  %p3892_p9 = por %p468_p5, %p72_p3 }
  0x51   : > { %s4558_s28 = scalar_select %p3888_p13, 1, 0 }
  0x52   : > { %s4557_s9 = scalar_select %p3881_p12, 1, 0 }
  0x53   : > { %4559 = sst [smem:[#allocation42_spill]] %s4558_s28  ;;  %p4562_p0 = scmp.lt.s32.totalorder %s3616_s16, 4 }
  0x54   : > { %s4560_s8 = scalar_select %p3892_p9, 1, 0 }
  0x55   : > { %p3898_p7 = pnand %p4562_p0, %p68_p11  ;;  %s2740_s4 = sshll.u32 %s3612_s30, 4 }
  0x56   : > { %4561 = sst [smem:[#allocation43_spill]] %s4560_s8  ;;  %s546_s1 = scalar_lea.vmem [#allocation10], %s3886_s22 }
  0x57   : > { %s4564_s2 = sld [smem:[#allocation48_spill]]  ;;  %s553_s27 = sshll.u32 %s546_s1, 4  ;;  %s554_s27 = int_to_ptr.vmem [resolvable:$true] %s553_s27 }
  0x58   : > { %s4565_s3 = sld [smem:[#allocation49_spill]]  ;;  %s4495_s26 = scalar_lea.sflag [#allocation11], %s3829_s7 }
  0x59   : > { %p4494_p6 = pneg %p3898_p7  ;;  %s3297_s5 = scalar_lea.vmem %s554_s27, 16 }
  0x5a   : > { %p3298_p11 = scmp.ne.s32.totalorder %s554_s27, %s3297_s5  ;;  %s3619_s23 = smov [#allocation10]  }
  0x5b   : > { %s3302_s14 = sshll.u32 %s3619_s23, 4  ;;  %s3303_s14 = int_to_ptr.vmem [resolvable:$false] %s3302_s14 }
  0x5c   : > { %p3300_p3 = pnand %p3298_p11, %p4494_p6  ;;  %s3304_s15 = scalar_lea.vmem %s3303_s14, 32 }
  0x5d   : > { %s3906_s0 = scalar_lea.hbm %s4564_s2, %s2740_s4  ;;  %p3305_p5 = scmp.lt.s32.totalorder %s554_s27, %s3303_s14 }
  0x5e   : > { %s551_s6 = scalar_lea.hbm %s4565_s3, %s2740_s4  ;;  %p3301_p4 = pneg %p3300_p3 }
  0x5f   : > { %p3306_p10 = scmp.lt.s32.totalorder %s3304_s15, %s3297_s5 }
  0x61   : > { %p3307_p0 = por %p3306_p10, %p3305_p5 }
  0x63   : > { %p3308_p1 = pnand %p3307_p0, %p3301_p4 }
  0x65   : > { %3311 = shalt.err (!%p3308_p1)
}
  0x66   : > { %3061 = dma.hbm_to_vmem [thread:$0]  (!%p3898_p7), %s551_s6, 16, %s554_s27, %s4495_s26  }
  0x67   : > { %s295_s1 = sadd.s32 1, %s3572_s20  ;;  %p4566_p1 = scmp.eq.s32.totalorder %s3799_s13, 0 }
  0x68   : > { %p302_p11 = scmp.ne.s32.totalorder %s3572_s20, %s3568_s19  ;;  %p308_p3 = scmp.ne.s32.totalorder %s3568_s19, %s3564_s18 }
  0x69   : > { %s3926_s5 = scalar_select %p4566_p1, %s3572_s20, %s295_s1  }
  0x6a   : > { %s4496_s23 = sand.u32 1, %s3572_s20   ;;  %s2815_s4 = sshll.u32 %s3608_s29, 8 }
  0x6b   : > { %4567 = sst [smem:[#allocation44_spill]] %s3926_s5  ;;  %p4568_p4 = scmp.eq.s32.totalorder %s3616_s16, 0 }
  0x6c   : > { %p4569_p10 = scmp.eq.s32.totalorder %s3788_s17, 0  ;;  %s2742_s12 = sshll.u32 %s4496_s23, 4 }
  0x6d   : > { %p304_p5 = por %p302_p11, %p4568_p4  ;;  %s4572_s27 = sld [smem:[#allocation55_spill]] }
  0x6e   : > { %p3938_p0 = por %p308_p3, %p4569_p10  ;;  %p4573_p1 = scmp.lt.s32.totalorder %s3616_s16, 4 }
  0x6f   : > { %s603_s18 = scalar_lea.vmem [#allocation12], %s2742_s12  ;;  %s4575_s3 = sld [smem:[#allocation57_spill]] }
  0x70   : > { %s4570_s11 = scalar_select %p3938_p0, 1, 0 }
  0x71   : > { %p3951_p6 = pnand %p4573_p1, %p304_p5  ;;  %s610_s1 = sshll.u32 %s603_s18, 4  ;;  %s3955_s1 = int_to_ptr.vmem [resolvable:$true] %s610_s1 }
  0x72   : > { %4571 = sst [smem:[#allocation45_spill]] %s4570_s11  ;;  %s631_s5 = scalar_lea.vmem [#allocation13], %s2742_s12 }
  0x73   : > { %s3947_s13 = scalar_lea.hbm %s4572_s27, %s2815_s4  ;;  %s638_s8 = sshll.u32 %s631_s5, 4  ;;  %s639_s8 = int_to_ptr.vmem [resolvable:$true] %s638_s8 }
  0x74   : > { %s628_s14 = scalar_lea.sflag [#allocation14], %s3829_s7  ;;  %p4508_p11 = pneg %p3951_p6 }
  0x75   : > { %s637_s23 = scalar_lea.hbm %s4575_s3, %s2815_s4  ;;  %s3325_s6 = scalar_lea.vmem %s639_s8, 256 }
  0x76   : > { %p3326_p3 = scmp.ne.s32.totalorder %s639_s8, %s3325_s6  ;;  %s3620_s27 = smov [#allocation13]  }
  0x77   : > { %s3330_s18 = sshll.u32 %s3620_s27, 4  ;;  %s3331_s18 = int_to_ptr.vmem [resolvable:$false] %s3330_s18 }
  0x78   : > { %p3328_p4 = pnand %p3326_p3, %p4508_p11  ;;  %s3332_s24 = scalar_lea.vmem %s3331_s18, 512 }
  0x79   : > { %p3333_p10 = scmp.lt.s32.totalorder %s639_s8, %s3331_s18  ;;  %p3334_p1 = scmp.lt.s32.totalorder %s3332_s24, %s3325_s6 }
  0x7a   : > { %p3329_p5 = pneg %p3328_p4 }
  0x7b   : > { %p3335_p9 = por %p3334_p1, %p3333_p10 }
  0x7d   : > { %p3336_p13 = pnand %p3335_p9, %p3329_p5 }
  0x7f   : > { %3339 = shalt.err (!%p3336_p13)
}
  0x80   : > { %s3621_s2 = smov 64   ;;  %s3622_s3 = smov 4  }
  0x81   : > { %3067 = dma.hbm_to_vmem [thread:$0]  (!%p3951_p6), %s637_s23, 256, %s639_s8, %s628_s14, %s3621_s2, %s3621_s2, %s3622_s3  }
  0x82   : > { %s2735_s26 = sshll.u32 %s3886_s22, 3  ;;  %s2736_s24 = sshll.u32 %s3612_s30, 7 }
  0x83   : > { %s4576_s12 = sld [smem:[#allocation46_spill]]  ;;  %s492_s27 = scalar_lea.vmem [#allocation4], %s2735_s26 }
  0x84   : > { %s499_s18 = sshll.u32 %s492_s27, 4  ;;  %s529_s16 = scalar_lea.vmem [#allocation9], %s3886_s22  ;;  %s500_s18 = int_to_ptr.vmem [resolvable:$true] %s499_s18 }
  0x85   : > { %s536_s28 = sshll.u32 %s529_s16, 4  ;;  %s489_s11 = scalar_lea.sflag [#allocation5], %s3886_s22  ;;  %s537_s28 = int_to_ptr.vmem [resolvable:$true] %s536_s28 }
  0x86   : > { %s3353_s19 = scalar_lea.vmem %s500_s18, 128  ;;  %p4577_p9 = pneg %p3898_p7 }
  0x87   : > { %p3354_p13 = scmp.ne.s32.totalorder %s500_s18, %s3353_s19  ;;  %s3623_s17 = smov [#allocation4]  }
  0x88   : > { %s3358_s8 = sshll.u32 %s3623_s17, 4  ;;  %s3359_s8 = int_to_ptr.vmem [resolvable:$false] %s3358_s8 }
  0x89   : > { %s497_s6 = scalar_lea.hbm %s4576_s12, %s2736_s24  ;;  %p3356_p3 = pnand %p3354_p13, %p4577_p9 }
  0x8a   : > { %s3360_s23 = scalar_lea.vmem %s3359_s8, 256  ;;  %p3361_p5 = scmp.lt.s32.totalorder %s500_s18, %s3359_s8 }
  0x8b   : > { %p3357_p4 = pneg %p3356_p3  ;;  %p3362_p10 = scmp.lt.s32.totalorder %s3360_s23, %s3353_s19 }
  0x8d   : > { %p3363_p1 = por %p3362_p10, %p3361_p5 }
  0x8f   : > { %p3364_p11 = pnand %p3363_p1, %p3357_p4 }
  0x91   : > { %3367 = shalt.err (!%p3364_p11)
}
  0x92   : > { %3052 = dma.hbm_to_vmem [thread:$0]  (!%p3898_p7), %s497_s6, 128, %s500_s18, %s489_s11  }
  0x93   : > { %s3381_s16 = scalar_lea.vmem %s537_s28, 16  ;;  %p4578_p8 = pmov %p4577_p9 }
  0x94   : > { %p3382_p0 = scmp.ne.s32.totalorder %s537_s28, %s3381_s16  ;;  %s3624_s22 = smov [#allocation9]  }
  0x95   : > { %s3386_s17 = sshll.u32 %s3624_s22, 4  ;;  %s3387_s17 = int_to_ptr.vmem [resolvable:$false] %s3386_s17 }
  0x96   : > { %p3384_p13 = pnand %p3382_p0, %p4578_p8  ;;  %s3388_s26 = scalar_lea.vmem %s3387_s17, 32 }
  0x97   : > { %p3389_p3 = scmp.lt.s32.totalorder %s537_s28, %s3387_s17  ;;  %p3390_p12 = scmp.lt.s32.totalorder %s3388_s26, %s3381_s16 }
  0x98   : > { %p3385_p9 = pneg %p3384_p13 }
  0x99   : > { %p3391_p5 = por %p3390_p12, %p3389_p3 }
  0x9b   : > { %p3392_p4 = pnand %p3391_p5, %p3385_p9 }
  0x9d   : > { %3395 = shalt.err (!%p3392_p4)
}
  0x9e   : > { %s4579_s19 = scalar_lea.sflag [#allocation8], %s3829_s7  ;;  %s3409_s11 = scalar_lea.vmem %s3955_s1, 256 }
  0x9f   : > { %3058 = dma.hbm_to_vmem [thread:$0]  (!%p3898_p7), %s3906_s0, 16, %s537_s28, %s4579_s19  }
  0xa0   : > { %p3410_p8 = scmp.ne.s32.totalorder %s3955_s1, %s3409_s11  ;;  %p4580_p0 = pneg %p3951_p6 }
  0xa1   : > { %s3625_s24 = smov [#allocation12]  }
  0xa2   : > { %p3412_p11 = pnand %p3410_p8, %p4580_p0  ;;  %s3414_s5 = sshll.u32 %s3625_s24, 4  ;;  %s3415_s5 = int_to_ptr.vmem [resolvable:$false] %s3414_s5 }
  0xa3   : > { %s3416_s4 = scalar_lea.vmem %s3415_s5, 512  ;;  %p3417_p12 = scmp.lt.s32.totalorder %s3955_s1, %s3415_s5 }
  0xa4   : > { %p3413_p10 = pneg %p3412_p11  ;;  %p3418_p1 = scmp.lt.s32.totalorder %s3416_s4, %s3409_s11 }
  0xa6   : > { %p3419_p13 = por %p3418_p1, %p3417_p12 }
  0xa8   : > { %p3420_p9 = pnand %p3419_p13, %p3413_p10 }
  0xaa   : > { %3423 = shalt.err (!%p3420_p9)
}
  0xab   : > { %s4581_s28 = scalar_lea.sflag [#allocation11], %s3829_s7  ;;  %s2748_s21 = sshll.u32 %s3608_s29, 4 }
  0xac   : > { %3064 = dma.hbm_to_vmem [thread:$0]  (!%p3951_p6), %s3947_s13, 256, %s3955_s1, %s4581_s28, %s3621_s2, %s3621_s2, %s3622_s3  }
  0xad   : > { %s4582_s0 = sand.u32 1, %s3572_s20   ;;  %s4583_s8 = sld [smem:[#allocation58_spill]] }
  0xae   : > { %s651_s12 = scalar_lea.vmem [#allocation15], %s4582_s0  ;;  %p4584_p3 = pmov %p4580_p0 }
  0xaf   : > { %s658_s6 = sshll.u32 %s651_s12, 4  ;;  %s3626_s22 = smov [#allocation15]   ;;  %s659_s6 = int_to_ptr.vmem [resolvable:$true] %s658_s6 }
  0xb0   : > { %s3437_s16 = scalar_lea.vmem %s659_s6, 16  ;;  %s3442_s17 = sshll.u32 %s3626_s22, 4  ;;  %s3443_s17 = int_to_ptr.vmem [resolvable:$false] %s3442_s17 }
  0xb1   : > { %p3438_p7 = scmp.ne.s32.totalorder %s659_s6, %s3437_s16  ;;  %s3444_s26 = scalar_lea.vmem %s3443_s17, 32 }
  0xb2   : > { %p3445_p8 = scmp.lt.s32.totalorder %s659_s6, %s3443_s17  ;;  %p3446_p0 = scmp.lt.s32.totalorder %s3444_s26, %s3437_s16 }
  0xb3   : > { %s656_s23 = scalar_lea.hbm %s4583_s8, %s2748_s21  ;;  %p3440_p5 = pnand %p3438_p7, %p4584_p3 }
  0xb4   : > { %p3447_p11 = por %p3446_p0, %p3445_p8 }
  0xb5   : > { %p3441_p4 = pneg %p3440_p5 }
  0xb7   : > { %p3448_p10 = pnand %p3447_p11, %p3441_p4 }
  0xb9   : > { %3451 = shalt.err (!%p3448_p10)
}
  0xba   : > { %3070 = dma.hbm_to_vmem [thread:$0]  (!%p3951_p6), %s656_s23, 16, %s659_s6, %s628_s14  }
  0xbb   : > { %682 = sbr.rel (%p3861_p2) target bundleno = 4394 (0x112a), region = 80  ;;  %s4024_s13 = sand.u32 (!%p3861_p2), 1, %s3592_s25  }
  0xbc   : > { %s4512_s1 = sshll.u32 (!%p3861_p2), %s4024_s13, 3  ;;  %s685_s2 = scalar_lea.sflag (!%p3861_p2), [#allocation5], %s4024_s13 }
  0xbd   : > { %s4030_s3 = scalar_lea.vmem (!%p3861_p2), [#allocation4], %s4512_s1  ;;  %p4585_p12 = scmp.ne.s32.totalorder (!%p3861_p2), %s4557_s9, 0 }
  0xc0   : > { %3535 = dma.done.wait (%p4585_p12), %s685_s2, 128  }
  0xc1   : > { %3537 = vsyncadd (%p4585_p12), %s685_s2, 4294967168  ;;  %s4586_s7 = sld [smem:[#allocation36_spill]] }
  0xc2   : > { %s4587_s10 = sld [smem:[#allocation26_spill]] }
  0xc3   : > { %s4588_s15 = sld [smem:[#allocation39_spill]] }
  0xc7   : > { %s693_s14 = sand.u32 1, %s4586_s7  }
  0xc8   : > { %s695_s19 = sand.u32 1, %s4587_s10   ;;  %s694_s24 = scalar_lea.sflag [#allocation8], %s693_s14 }
  0xc9   : > { %s4038_s11 = sshll.u32 %s695_s19, 2  ;;  %p4589_p2 = scmp.ne.s32.totalorder %s4588_s15, 0 }
  0xcb   : > { %3539 = dma.done.wait (%p4589_p2), %s694_s24, 64  }
  0xcc   : > { %3541 = vsyncadd (%p4589_p2), %s694_s24, 4294967232 }
  0xcd   : > { %3543 = dma.done.wait (%p4585_p12), %s694_s24, 16  }
  0xce   : > { %3545 = vsyncadd (%p4585_p12), %s694_s24, 4294967280  ;;  %s711_s28 = scalar_lea.sflag [#allocation11], %s693_s14 }
  0xcf   : > { %3547 = dma.done.wait (%p4585_p12), %s711_s28, 16  }
  0xd0   : > { %3549 = vsyncadd (%p4585_p12), %s711_s28, 4294967280  ;;  %s4590_s0 = sld [smem:[#allocation24_spill]] }
  0xd1   : > { %s4591_s12 = sld [smem:[#allocation45_spill]] }
  0xd6   : > { %s720_s6 = sand.u32 1, %s4590_s0  }
  0xd7   : > { %s4056_s27 = sshll.u32 %s720_s6, 4  ;;  %p4592_p6 = scmp.ne.s32.totalorder %s4591_s12, 0 }
  0xd9   : > { %3551 = dma.done.wait (%p4592_p6), %s711_s28, 256  }
  0xda   : > { %3553 = vsyncadd (%p4592_p6), %s711_s28, 4294967040  ;;  %s728_s8 = scalar_lea.sflag [#allocation14], %s693_s14 }
  0xdb   : > { %3555 = dma.done.wait (%p4592_p6), %s728_s8, 272  }
  0xdc   : > { %3557 = vsyncadd (%p4592_p6), %s728_s8, 4294967024  ;;  %s4593_s9 = sld [smem:[#allocation31_spill]]  ;;  %s4602_s23 = sshll.u32 %s4024_s13, 3 }
  0xdd   : > { %s4594_s7 = sld [smem:[#allocation50_spill]]  ;;  %s4113_s26 = scalar_lea.vmem [#allocation16], %s4602_s23 }
  0xde   : > { %s4595_s19 = sld [smem:[#allocation51_spill]] }
  0xdf   : > { %s4597_s5 = sld [smem:[#allocation53_spill]] }
  0xe0   : > { %s4598_s21 = sld [smem:[#allocation54_spill]] }
  0xe1   : > { %s4599_s29 = sld [smem:[#allocation56_spill]] }
  0xe2   : > { %p850_p1 = scmp.lt.s32.totalorder %s4593_s9, 1  ;;  %s4600_s20 = sld [smem:[#allocation60_spill]] }
  0xe3   : > { %s4601_s8 = sld [smem:[#allocation59_spill]]  ;;  %p2768_p13 = scmp.ne.s32.totalorder %s4593_s9, 0 }
  0xe4   : > { %s851_s16 = scalar_select %p850_p1, %s4593_s9, 1 }
  0xe5   : > { %s4604_s25 = scalar_lea.vmem (!%p2768_p13), [#allocation9], %s4024_s13 }
  0xe6   : > { %s2817_s22 = sshll.u32 %s851_s16, 4  ;;  %s4070_s17 = sshll.u32 %s851_s16, 2 }
  0xe7   : > { %s4075_s10 = scalar_lea.vmem %s4594_s7, %s2817_s22  ;;  %s4080_s24 = scalar_lea.vmem %s4595_s19, %s2817_s22 }
  0xe8   : > { %s4089_s4 = scalar_lea.vmem %s4597_s5, %s2817_s22  ;;  %s4094_s1 = scalar_lea.vmem %s4598_s21, %s2817_s22 }
  0xe9   : > { %s877_s15 = scalar_lea.vmem %s4599_s29, %s4070_s17  ;;  %s2821_s14 = sshll.u32 %s851_s16, 5 }
  0xea   : > { %s886_s28 = scalar_lea.vmem %s4600_s20, %s4070_s17  ;;  %s4107_s18 = scalar_lea.vmem %s4601_s8, %s2821_s14 }
  0xeb   : > { %s4109_s5 = scalar_lea.vmem [#allocation15], %s720_s6  ;;  %891 = sbr.rel (%p2768_p13) target bundleno = 251 (0xfb), region = 112 }
  0xec   : > { %s4603_s20 = scalar_lea.vmem (!%p2768_p13), [#allocation10], %s4024_s13 }
  0xf0   : > { %v892_v0 = vld [vmem:[%s4030_s3] sm:$0xff]  ;;  %vm893_vm0 = vcmask 261120   ;;  %v895_v1 = vlaneseq  ;;  %v914_v2 = vld [vmem:[%s4603_s20] sm:$0x1]  ;;  %v3627_v6 = vmov 0.0   ;;  %vm912_vm3 = vcmask 64512  }
  0xf1   : > { %894 = vst.msk [vmem:[%s4113_s26] sm:$0xff] %vm893_vm0, %v892_v0  ;;  %vm915_vm1 = vcmp.gt.f32.partialorder %v914_v2, 0.5  ;;  %v2770_v5 = vld [vmem:[%s4604_s25] ss:$0 sm:$0xff] }
  0xf2   : > { %v896_v3 = vand.u32 127, %v895_v1  ;;  %v898_v4 = vshrl.u32 %v895_v1, 7  ;;  %v916_v7 = vsel %vm915_vm1, -1e+09, %v3627_v6 }
  0xf4   : > { %vm899_vm2 = vcmp.gt.s32.totalorder %v896_v3, %v898_v4  ;;  %v920_v8 = vsub.s32 0, %v898_v4 }
  0xf5   : > { %v2769_v9 = vsel %vm899_vm2, 1.0, %v3627_v6 }
  0xf6   : > { %v909_v10 = vadd.f32 %v2770_v5, %v2769_v9  ;;  %v921_v11 = vrot.slane %v916_v7, %v920_v8 }
  0xf8   : > { %vm910_vm4 = vcmp.gt.f32.partialorder %v909_v10, 0.5  ;;  %923 = vst.msk [vmem:[#allocation3] sm:$0xff] %vm912_vm3, %v921_v11 }
  0xf9   : > { %v911_v12 = vsel %vm910_vm4, -1e+09, %v3627_v6 }
  0xfa   : > { %913 = vst.msk [vmem:[#allocation2] sm:$0xff] %vm912_vm3, %v911_v12 }
  0xfb PF: > { %v3202_v13 = vld [vmem:[%s4075_s10 + $0x8] sm:$0xff]   ;;  %v3628_v14 = vmov 0.0   ;;  %v3203_v15 = vld [vmem:[%s4075_s10] sm:$0xff]   ;;  %vm3629_vm5 = vmmov 0   ;;  %vm942_vm6 = vcmask 261120   ;;  %s3630_s29 = smov 104  }
  0xfc   : > { %2877 = vmatprep.subr.bf16.mxu1 %v3628_v14  ;;  %2891 = vmatprep.subr.bf16.mxu0 %v3628_v14  ;;  %v4129_v16 = vld [vmem:[%s4113_s26] sm:$0xff]  ;;  %s3631_s30 = smov 120   ;;  %s3632_s3 = smov 112   ;;  %vm1008_vm7 = vcmask 64512   ;;  %vm1264_vm8 = vcmask 1043456   ;;  %vm1465_vm9 = vcmask 130048  }
  0xfd   : > { %2878 = vmatpush3.bf16.msra.mxu1 %v3202_v13  ;;  %2881 = vmatprep.mubr.msk.bf16.mxu1 %vm3629_vm5, %v3628_v14  ;;  %v925_v17 = vpack.c.bf16 %v4129_v16, %v4129_v16  ;;  %s3633_s21 = smov 96   ;;  %s3634_s6 = smov 64   ;;  %vm1467_vm10 = vcmask 195584   ;;  %vm2349_vm11 = vcmask 523264  }
  0xfe   : > { %2879 = vmatprep.subr.bf16.mxu1 %v3628_v14  ;;  %2893 = vmatprep.mubr.msk.bf16.mxu0 %vm3629_vm5, %v3628_v14  ;;  %s3635_s9 = smov 8   ;;  %s3636_s16 = smov 16  }
  0xff   : > { %s3637_s22 = smov 24   ;;  %s4605_s8 = sld [smem:[#allocation52_spill]] }
 0x100   : > { %s4607_s7 = scalar_lea.vmem [#allocation7], %s4038_s11 }
 0x101   : > { %2880 = vmatpush3.bf16.msra.mxu1 %v3203_v15  ;;  %v1206_v38 = vld [vmem:[#allocation2] sm:$0xff] }
 0x102   : > { %2885 = vmatprep.subr.bf16.mxu1 %v3628_v14 }
 0x104   : > { %2882 = vmatmul.mubr.msk.bf16.vlgmr.msra.gmra.mxu1 %vm942_vm6, %v925_v17 }
 0x105   : > { %2887 = vmatprep.mubr.msk.bf16.mxu1 %vm3629_vm5, %v3628_v14  ;;  %s4606_s2 = scalar_lea.vmem %s4605_s8, %s4070_s17  ;;  %s4615_s17 = sld [smem:[#allocation42_spill]] }
 0x10b   : > { %p4618_p7 = scmp.ne.s32.totalorder %s4615_s17, 0 }
 0x1c4   : > { %v980_v18 = vpop.f32.mrf.mxu1 }
 0x1c5   : > { %998 = vrot.lane.b32.xlu1 %v980_v18, %s3630_s29  ;;  %992 = vrot.lane.b32.xlu0 %v980_v18, %s3631_s30  ;;  %v4142_v20 = vpack.c.bf16 %v980_v18, %v980_v18 }
 0x1c6   : > { %v2883_v19 = vpop.f32.mrf.mxu1 }
 0x1c8   : > { %v983_v21 = vpop.f32.mrf.mxu1 }
 0x1c9   : > { %995 = vrot.lane.b32.xlu0 %v980_v18, %s3632_s3  ;;  %1006 = vrot.lane.b32.xlu1 %v4142_v20, %s3633_s21 }
 0x1ca   : > { %v2884_v22 = vpop.f32.mrf.mxu1 }
 0x237   : > { %v999_v23 = vpop.permute.xlu1 %998  ;;  %v993_v24 = vpop.permute.xlu0 %992 }
 0x238   : > { %v4147_v25 = vpack.c.bf16 %v993_v24, %v993_v24  ;;  %v4151_v28 = vpack.c.bf16 %v999_v23, %v999_v23 }
 0x23a   : > { %1056 = vrot.lane.b32.xlu0 %v4147_v25, %s3633_s21 }
 0x23b   : > { %v996_v26 = vpop.permute.xlu0 %995  ;;  %v1007_v27 = vpop.permute.xlu1 %1006 }
 0x23c   : > { %v4153_v29 = vpack.c.bf16 %v996_v26, %v996_v26  ;;  %v1013_v30 = vsel %vm1008_vm7, %v1007_v27, 0 }
 0x23d   : > { %2886 = vmatpush3.bf16.xpose.msra.mxu1 %v1013_v30 }
 0x23e   : > { %1154 = vrot.lane.b32.xlu0 %v4151_v28, %s3633_s21  ;;  %1105 = vrot.lane.b32.xlu1 %v4153_v29, %s3633_s21 }
 0x23f   : > { %2897 = vmatprep.subr.bf16.mxu1 %v3628_v14 }
 0x244   : > { %2888 = vmatmul.mubr.msk.bf16.vlgmr.msra.gmra.mxu1 %vm1008_vm7, %v4142_v20 }
 0x245   : > { %2899 = vmatprep.mubr.msk.bf16.mxu1 %vm3629_vm5, %v3628_v14 }
 0x2ac   : > { %v1057_v31 = vpop.permute.xlu0 %1056 }
 0x2ad   : > { %v1062_v32 = vsel %vm1008_vm7, %v1057_v31, 0 }
 0x2ae   : > { %2892 = vmatpush3.bf16.xpose.msra.mxu0 %v1062_v32 }
 0x2af   : > { %2903 = vmatprep.subr.bf16.mxu0 %v3628_v14 }
 0x2b0   : > { %v1106_v33 = vpop.permute.xlu1 %1105  ;;  %v1155_v35 = vpop.permute.xlu0 %1154 }
 0x2b1   : > { %v1111_v34 = vsel %vm1008_vm7, %v1106_v33, 0  ;;  %v1160_v36 = vsel %vm1008_vm7, %v1155_v35, 0 }
 0x2b2   : > { %2898 = vmatpush3.bf16.xpose.msra.mxu1 %v1111_v34 }
 0x2b3   : > { %2909 = vmatprep.subr.bf16.mxu1 %v3628_v14 }
 0x2b5   : > { %2894 = vmatmul.mubr.msk.bf16.vlgmr.msra.gmra.mxu0 %vm1008_vm7, %v4147_v25 }
 0x2b6   : > { %2904 = vmatpush3.bf16.xpose.msra.mxu0 %v1160_v36  ;;  %2905 = vmatprep.mubr.msk.bf16.mxu0 %vm3629_vm5, %v3628_v14 }
 0x2b7   : > { %2915 = vmatprep.subr.bf16.mxu0 %v3628_v14 }
 0x2b9   : > { %2900 = vmatmul.mubr.msk.bf16.vlgmr.msra.gmra.mxu1 %vm1008_vm7, %v4153_v29 }
 0x2ba   : > { %2911 = vmatprep.mubr.msk.bf16.mxu1 %vm3629_vm5, %v3628_v14 }
 0x2bd   : > { %2906 = vmatmul.mubr.msk.bf16.vlgmr.msra.gmra.mxu0 %vm1008_vm7, %v4151_v28 }
 0x2be   : > { %2917 = vmatprep.mubr.msk.bf16.mxu0 %vm3629_vm5, %v3628_v14 }
 0x304   : > { %v1049_v37 = vpop.f32.mrf.mxu1 }
 0x305   : > { %v1202_v39 = vmul.f32 0.35355338, %v1049_v37 }
 0x306   : > { %v2889_v40 = vpop.f32.mrf.mxu1 }
 0x307   : > { %v1207_v41 = vadd.f32 %v1206_v38, %v1202_v39 }
 0x308   : > { %v1052_v42 = vpop.f32.mrf.mxu1 }
 0x309   : > { %v1211_v43 = vsel %vm1008_vm7, %v1207_v41, -inf }
 0x30a   : > { %1212 = vmax.xlane.f32.xlu1 %v1211_v43  ;;  %v2890_v44 = vpop.f32.mrf.mxu1 }
 0x375   : > { %v1098_v45 = vpop.f32.mrf.mxu0 }
 0x376   : > { %v1203_v46 = vmul.f32 0.35355338, %v1098_v45 }
 0x377   : > { %v2895_v47 = vpop.f32.mrf.mxu0 }
 0x378   : > { %v1208_v48 = vadd.f32 %v1206_v38, %v1203_v46 }
 0x379   : > { %v1101_v49 = vpop.f32.mrf.mxu0  ;;  %v1147_v50 = vpop.f32.mrf.mxu1 }
 0x37a   : > { %v1204_v51 = vmul.f32 0.35355338, %v1147_v50  ;;  %v1214_v52 = vsel %vm1008_vm7, %v1208_v48, -inf }
 0x37b   : > { %1215 = vmax.xlane.f32.xlu0 %v1214_v52  ;;  %v2896_v53 = vpop.f32.mrf.mxu0  ;;  %v2901_v54 = vpop.f32.mrf.mxu1  ;;  %v3204_v52 = vld [vmem:[%s4080_s24 + $0x8] sm:$0xff]  }
 0x37c   : > { %v1209_v55 = vadd.f32 %v1206_v38, %v1204_v51  ;;  %v3205_v53 = vld [vmem:[%s4080_s24] sm:$0xff]  }
 0x37d   : > { %v1150_v56 = vpop.f32.mrf.mxu1  ;;  %v1196_v57 = vpop.f32.mrf.mxu0 }
 0x37e   : > { %v1205_v58 = vmul.f32 0.35355338, %v1196_v57  ;;  %v1217_v59 = vsel %vm1008_vm7, %v1209_v55, -inf }
 0x37f   : > { %v2907_v60 = vpop.f32.mrf.mxu0  ;;  %1218 = vmax.xlane.f32.xlu0 %v1217_v59  ;;  %v2902_v61 = vpop.f32.mrf.mxu1 }
 0x380   : > { %v1210_v62 = vadd.f32 %v1206_v38, %v1205_v58 }
 0x381   : > { %v1199_v63 = vpop.f32.mrf.mxu0 }
 0x382   : > { %v1220_v0 = vsel %vm1008_vm7, %v1210_v62, -inf }
 0x383   : > { %v2908_v1 = vpop.f32.mrf.mxu0  ;;  %1221 = vmax.xlane.f32.xlu1 %v1220_v0 }
 0x393   : > { %v1213_v2 = vpop.xlane.xlu1 %1212 }
 0x394   : > { %1308 = vrot.lane.b32.xlu1 %v4147_v25, %s3634_s6  ;;  %v1223_v3 = vsub.f32 %v1207_v41, %v1213_v2 }
 0x395   : > { %1259 = vrot.lane.b32.xlu0 %v4142_v20, %s3634_s6 }
 0x396   : > { %v1227_v4 = vmul.f32 1.442695, %v1223_v3 }
 0x398   : > { %3218 = vpow2.f32 %v1227_v4 }
 0x3a5   : > { %v3219_v5 = vpop.eup %3218 }
 0x3a6   : > { %v1235_v6 = vsel %vm1008_vm7, %v3219_v5, 0.0 }
 0x3b4   : > { %1236 = vadd.xlane.f32.xlu0 %v1235_v6 }
 0x404   : > { %v1216_v7 = vpop.xlane.xlu0 %1215 }
 0x405   : > { %v1224_v8 = vsub.f32 %v1208_v48, %v1216_v7 }
 0x407   : > { %v1229_v9 = vmul.f32 1.442695, %v1224_v8 }
 0x408   : > { %v1219_v10 = vpop.xlane.xlu0 %1218 }
 0x409   : > { %3220 = vpow2.f32 %v1229_v9  ;;  %v1225_v11 = vsub.f32 %v1209_v55, %v1219_v10  ;;  %v1470_v9 = vlaneseq }
 0x40b   : > { %v1231_v12 = vmul.f32 1.442695, %v1225_v11  ;;  %v1471_v10 = vshrl.u32 %v1470_v9, 7 }
 0x40c   : > { %v1222_v13 = vpop.xlane.xlu1 %1221  ;;  %v1260_v15 = vpop.permute.xlu0 %1259 }
 0x40d   : > { %3222 = vpow2.f32 %v1231_v12  ;;  %v1226_v17 = vsub.f32 %v1210_v62, %v1222_v13  ;;  %v1266_v18 = vsel %vm1264_vm8, %v1260_v15, 0  ;;  %v4232_v11 = vsub.s32 0, %v1471_v10  ;;  %v986_v12 = vld [vmem:[%s4606_s2] sm:$0x7] }
 0x40e   : > { %2910 = vmatpush3.bf16.msra.mxu1 %v1266_v18 }
 0x40f   : > { %v1233_v19 = vmul.f32 1.442695, %v1226_v17  ;;  %2921 = vmatprep.subr.bf16.mxu1 %v3628_v14  ;;  %v1473_v13 = vrot.slane %v986_v12, %v4232_v11 }
 0x410   : > { %v1309_v20 = vpop.permute.xlu1 %1308 }
 0x411   : > { %3224 = vpow2.f32 %v1233_v19  ;;  %v1314_v21 = vsel %vm1264_vm8, %v1309_v20, 0 }
 0x412   : > { %2916 = vmatpush3.bf16.msra.mxu0 %v1314_v21 }
 0x413   : > { %2927 = vmatprep.subr.bf16.mxu0 %v3628_v14 }
 0x416   : > { %v3221_v22 = vpop.eup %3220 }
 0x417   : > { %v1238_v23 = vsel %vm1008_vm7, %v3221_v22, 0.0 }
 0x418   : > { %1239 = vadd.xlane.f32.xlu1 %v1238_v23 }
 0x41a   : > { %v3223_v24 = vpop.eup %3222 }
 0x41b   : > { %v1241_v25 = vsel %vm1008_vm7, %v3223_v24, 0.0 }
 0x41c   : > { %1242 = vadd.xlane.f32.xlu0 %v1241_v25 }
 0x41e   : > { %v3225_v26 = vpop.eup %3224 }
 0x41f   : > { %v1244_v27 = vsel %vm1008_vm7, %v3225_v26, 0.0 }
 0x420   : > { %1245 = vadd.xlane.f32.xlu1 %v1244_v27 }
 0x431   : > { %1356 = vrot.lane.b32.xlu1 %v4153_v29, %s3634_s6 }
 0x432   : > { %1404 = vrot.lane.b32.xlu0 %v4151_v28, %s3634_s6 }
 0x43d   : > { %v1237_v30 = vpop.xlane.xlu0 %1236 }
 0x43e   : > { %3226 = vrcp.f32 %v1237_v30  ;;  %v3206_v30 = vld [vmem:[%s4094_s1 + $0x8] sm:$0xff]  }
 0x44b   : > { %v3227_v31 = vpop.eup %3226 }
 0x44c   : > { %v1251_v32 = vmul.f32 %v3227_v31, %v3219_v5  ;;  %v1554_v31 = vld [vmem:[%s4607_s7] sm:$0xf] }
 0x44e   : > { %v1255_v33 = vpack.c.bf16 %v1251_v32, %v1251_v32  ;;  %v3208_v32 = vld [vmem:[%s4089_s4 + $0x8] sm:$0xff]  }
 0x450   : > { %2912 = vmatmul.mubr.msk.bf16.vlgmr.msra.gmra.mxu1 %vm1008_vm7, %v1255_v33  ;;  %v3209_v33 = vld [vmem:[%s4089_s4] sm:$0xff]  }
 0x451   : > { %2923 = vmatprep.mubr.msk.bf16.mxu1 %vm3629_vm5, %v3628_v14 }
 0x4a1   : > { %v1240_v34 = vpop.xlane.xlu1 %1239 }
 0x4a2   : > { %3228 = vrcp.f32 %v1240_v34 }
 0x4a5   : > { %v1243_v35 = vpop.xlane.xlu0 %1242 }
 0x4a6   : > { %3230 = vrcp.f32 %v1243_v35 }
 0x4a9   : > { %v1246_v36 = vpop.xlane.xlu1 %1245  ;;  %v1405_v39 = vpop.permute.xlu0 %1404 }
 0x4aa   : > { %3232 = vrcp.f32 %v1246_v36  ;;  %v1410_v42 = vsel %vm1264_vm8, %v1405_v39, 0 }
 0x4ad   : > { %v1357_v29 = vpop.permute.xlu1 %1356 }
 0x4ae   : > { %v1362_v37 = vsel %vm1264_vm8, %v1357_v29, 0  ;;  %v4256_v29 = vsub.s32 1, %v1471_v10 }
 0x4af   : > { %v3229_v28 = vpop.eup %3228  ;;  %2922 = vmatpush3.bf16.msra.mxu1 %v1362_v37  ;;  %v4258_v37 = vsub.s32 2, %v1471_v10 }
 0x4b0   : > { %v1252_v38 = vmul.f32 %v3229_v28, %v3221_v22  ;;  %2933 = vmatprep.subr.bf16.mxu1 %v3628_v14  ;;  %v1547_v28 = vrot.slane %v986_v12, %v4256_v29 }
 0x4b1   : > { %v1552_v39 = vrot.slane %v986_v12, %v4258_v37 }
 0x4b2   : > { %v1256_v40 = vpack.c.bf16 %v1252_v38, %v1252_v38 }
 0x4b3   : > { %v3231_v41 = vpop.eup %3230 }
 0x4b4   : > { %2918 = vmatmul.mubr.msk.bf16.vlgmr.msra.gmra.mxu0 %vm1008_vm7, %v1256_v40  ;;  %v1253_v43 = vmul.f32 %v3231_v41, %v3223_v24 }
 0x4b5   : > { %2928 = vmatpush3.bf16.msra.mxu0 %v1410_v42  ;;  %2929 = vmatprep.mubr.msk.bf16.mxu0 %vm3629_vm5, %v3628_v14 }
 0x4b6   : > { %v1257_v44 = vpack.c.bf16 %v1253_v43, %v1253_v43  ;;  %2941 = vmatprep.subr.bf16.mxu0 %v3628_v14 }
 0x4b7   : > { %v3233_v45 = vpop.eup %3232 }
 0x4b8   : > { %2924 = vmatmul.mubr.msk.bf16.vlgmr.msra.gmra.mxu1 %vm1008_vm7, %v1257_v44  ;;  %v1254_v46 = vmul.f32 %v3233_v45, %v3225_v26 }
 0x4b9   : > { %2937 = vmatprep.mubr.msk.bf16.mxu1 %vm3629_vm5, %v3628_v14  ;;  %2934 = vmatpush3.bf16.msra.mxu1 %v3204_v52 }
 0x4ba   : > { %v1258_v47 = vpack.c.bf16 %v1254_v46, %v1254_v46  ;;  %2935 = vmatprep.subr.bf16.mxu1 %v3628_v14 }
 0x4bc   : > { %2930 = vmatmul.mubr.msk.bf16.vlgmr.msra.gmra.mxu0 %vm1008_vm7, %v1258_v47 }
 0x4bd   : > { %2945 = vmatprep.mubr.msk.bf16.mxu0 %vm3629_vm5, %v3628_v14  ;;  %2936 = vmatpush3.bf16.msra.mxu1 %v3205_v53 }
 0x4be   : > { %2949 = vmatprep.subr.bf16.mxu1 %v3628_v14  ;;  %2942 = vmatpush3.bf16.msra.mxu0 %v3208_v32 }
 0x4bf   : > { %2943 = vmatprep.subr.bf16.mxu0 %v3628_v14 }
 0x4c2   : > { %2944 = vmatpush3.bf16.msra.mxu0 %v3209_v33 }
 0x4c3   : > { %2957 = vmatprep.subr.bf16.mxu0 %v3628_v14 }
 0x510   : > { %v1302_v48 = vpop.f32.mrf.mxu1 }
 0x512   : > { %v2913_v49 = vpop.f32.mrf.mxu1 }
 0x514   : > { %v1305_v50 = vpop.f32.mrf.mxu1 }
 0x516   : > { %v2914_v51 = vpop.f32.mrf.mxu1 }
 0x574   : > { %v1350_v54 = vpop.f32.mrf.mxu0 }
 0x575   : > { %1453 = vrot.lane.b32.xlu1 %v1350_v54, %s3635_s9 }
 0x576   : > { %v2919_v55 = vpop.f32.mrf.mxu0 }
 0x578   : > { %v1353_v56 = vpop.f32.mrf.mxu0  ;;  %v1398_v57 = vpop.f32.mrf.mxu1 }
 0x579   : > { %1457 = vrot.lane.b32.xlu0 %v1398_v57, %s3636_s16 }
 0x57a   : > { %v2920_v58 = vpop.f32.mrf.mxu0  ;;  %v2925_v59 = vpop.f32.mrf.mxu1 }
 0x57c   : > { %v1401_v60 = vpop.f32.mrf.mxu1  ;;  %v1446_v61 = vpop.f32.mrf.mxu0 }
 0x57d   : > { %1461 = vrot.lane.b32.xlu1 %v1446_v61, %s3637_s22 }
 0x57e   : > { %v2926_v62 = vpop.f32.mrf.mxu1  ;;  %v2931_v63 = vpop.f32.mrf.mxu0 }
 0x580   : > { %v1449_v0 = vpop.f32.mrf.mxu0 }
 0x582   : > { %v2932_v1 = vpop.f32.mrf.mxu0 }
 0x5e7   : > { %v1454_v2 = vpop.permute.xlu1 %1453 }
 0x5e8   : > { %v1464_v4 = vsel %vm1008_vm7, %v1302_v48, %v1454_v2 }
 0x5eb   : > { %v1458_v3 = vpop.permute.xlu0 %1457 }
 0x5ec   : > { %v1466_v5 = vsel %vm1465_vm9, %v1464_v4, %v1458_v3 }
 0x5ef   : > { %v1462_v6 = vpop.permute.xlu1 %1461 }
 0x5f0   : > { %v1468_v7 = vsel %vm1467_vm10, %v1466_v5, %v1462_v6 }
 0x5f1   : > { %v1469_v8 = vpack.c.bf16 %v1468_v7, %v1468_v7  ;;  %v1895_v7 = vld [vmem:[#allocation3] sm:$0xff] }
 0x5f3   : > { %2938 = vmatmul.mubr.msk.bf16.vlgmr.msra.gmra.mxu1 %vm942_vm6, %v1469_v8 }
 0x5f4   : > { %2953 = vmatprep.mubr.msk.bf16.mxu1 %vm3629_vm5, %v3628_v14  ;;  %2950 = vmatpush3.bf16.msra.mxu1 %v3206_v30 }
 0x5f5   : > { %2951 = vmatprep.subr.bf16.mxu1 %v3628_v14 }
 0x6b3   : > { %v1523_v15 = vpop.f32.mrf.mxu1 }
 0x6b4   : > { %v1524_v17 = vadd.f32 %v1523_v15, %v1473_v13 }
 0x6b5   : > { %v2939_v18 = vpop.f32.mrf.mxu1 }
 0x6b6   : > { %v1529_v19 = vadd.f32 %v1524_v17, %v4129_v16  ;;  %v3207_v16 = vld [vmem:[%s4094_s1] sm:$0xff]   ;;  %s4608_s1 = scalar_lea.vmem [#allocation12], %s4056_s27 }
 0x6b7   : > { %v1526_v20 = vpop.f32.mrf.mxu1  ;;  %2952 = vmatpush3.bf16.msra.mxu1 %v3207_v16  ;;  %s4609_s11 = smov %s4608_s1 }
 0x6b8   : > { %v1530_v21 = vsel %vm942_vm6, %v1529_v19, 0.0  ;;  %2963 = vmatprep.subr.bf16.mxu1 %v3628_v14 }
 0x6b9   : > { %1531 = vadd.xlane.f32.xlu0 %v1530_v21  ;;  %v2940_v22 = vpop.f32.mrf.mxu1 }
 0x6ba   : > { %2954 = vmatmul.mubr.msk.bf16.vlgmr.msra.gmra.mxu1 %vm942_vm6, %v1554_v31 }
 0x6bb   : > { %2965 = vmatprep.mubr.msk.bf16.mxu1 %vm3629_vm5, %v3628_v14 }
 0x742   : > { %v1532_v23 = vpop.xlane.xlu0 %1531 }
 0x743   : > { %v1534_v24 = vmul.f32 0.03125, %v1532_v23 }
 0x745   : > { %v1535_v25 = vsub.f32 %v1529_v19, %v1534_v24 }
 0x747   : > { %v1536_v26 = vmul.f32 %v1535_v25, %v1535_v25 }
 0x749   : > { %v1537_v27 = vsel %vm942_vm6, %v1536_v26, 0.0 }
 0x74a   : > { %1538 = vadd.xlane.f32.xlu1 %v1537_v27 }
 0x77a   : > { %v1668_v44 = vpop.f32.mrf.mxu1 }
 0x77b   : > { %1697 = vrot.lane.b32.xlu1 %v1668_v44, %s3632_s3  ;;  %1694 = vrot.lane.b32.xlu0 %v1668_v44, %s3631_s30  ;;  %v4271_v45 = vpack.c.bf16 %v1668_v44, %v1668_v44 }
 0x77c   : > { %v2955_v46 = vpop.f32.mrf.mxu1 }
 0x77d   : > { %v1711_v47 = vsel %vm1008_vm7, %v4271_v45, 0 }
 0x77e   : > { %v1671_v48 = vpop.f32.mrf.mxu1 }
 0x77f   : > { %1700 = vrot.lane.b32.xlu1 %v1668_v44, %s3630_s29 }
 0x780   : > { %v2956_v49 = vpop.f32.mrf.mxu1 }
 0x7d3   : > { %v1539_v34 = vpop.xlane.xlu1 %1538 }
 0x7d4   : > { %v1540_v35 = vmul.f32 0.03125, %v1539_v34 }
 0x7d6   : > { %v1541_v36 = vadd.f32 1e-06, %v1540_v35 }
 0x7d8   : > { %3234 = vrsqrt.f32 %v1541_v36 }
 0x7e5   : > { %v3235_v38 = vpop.eup %3234 }
 0x7e6   : > { %v1543_v40 = vmul.f32 %v3235_v38, %v1535_v25 }
 0x7e8   : > { %v1548_v41 = vmul.f32 %v1547_v28, %v1543_v40 }
 0x7ea   : > { %v4262_v42 = vadd.f32 %v1552_v39, %v1548_v41 }
 0x7ec   : > { %v1555_v43 = vpack.c.bf16 %v4262_v42, %v4262_v42 }
 0x7ed   : > { %v1695_v50 = vpop.permute.xlu0 %1694  ;;  %v1698_v53 = vpop.permute.xlu1 %1697 }
 0x7ee   : > { %2946 = vmatmul.mubr.msk.bf16.vlgmr.msra.gmra.mxu0 %vm942_vm6, %v1555_v43  ;;  %v4277_v51 = vpack.c.bf16 %v1695_v50, %v1695_v50  ;;  %v4282_v54 = vpack.c.bf16 %v1698_v53, %v1698_v53 }
 0x7ef   : > { %2959 = vmatprep.mubr.msk.bf16.mxu0 %vm3629_vm5, %v3628_v14  ;;  %2958 = vmatpush3.bf16.xpose.msra.mxu0 %v1711_v47 }
 0x7f0   : > { %2969 = vmatprep.subr.bf16.mxu0 %v3628_v14  ;;  %v1757_v52 = vsel %vm1008_vm7, %v4277_v51, 0  ;;  %v1803_v57 = vsel %vm1008_vm7, %v4282_v54, 0 }
 0x7f1   : > { %2964 = vmatpush3.bf16.xpose.msra.mxu1 %v1757_v52  ;;  %v1701_v61 = vpop.permute.xlu1 %1700 }
 0x7f2   : > { %2975 = vmatprep.subr.bf16.mxu1 %v3628_v14  ;;  %v4293_v62 = vpack.c.bf16 %v1701_v61, %v1701_v61 }
 0x7f4   : > { %v1849_v1 = vsel %vm1008_vm7, %v4293_v62, 0 }
 0x8ae   : > { %v1609_v55 = vpop.f32.mrf.mxu0 }
 0x8af   : > { %v1689_v56 = vpack.c.bf16 %v1609_v55, %v1609_v55  ;;  %1686 = vrot.lane.b32.xlu1 %v1609_v55, %s3630_s29  ;;  %1680 = vrot.lane.b32.xlu0 %v1609_v55, %s3631_s30  ;;  %s4616_s29 = sld [smem:[#allocation61_spill]] }
 0x8b0   : > { %v2947_v58 = vpop.f32.mrf.mxu0 }
 0x8b1   : > { %2960 = vmatmul.mubr.msk.bf16.vlgmr.msra.gmra.mxu0 %vm1008_vm7, %v1689_v56 }
 0x8b2   : > { %v1612_v59 = vpop.f32.mrf.mxu0  ;;  %2970 = vmatpush3.bf16.xpose.msra.mxu0 %v1803_v57  ;;  %2971 = vmatprep.mubr.msk.bf16.mxu0 %vm3629_vm5, %v3628_v14 }
 0x8b3   : > { %1683 = vrot.lane.b32.xlu0 %v1609_v55, %s3632_s3  ;;  %2981 = vmatprep.subr.bf16.mxu0 %v3628_v14 }
 0x8b4   : > { %v2948_v60 = vpop.f32.mrf.mxu0 }
 0x8b5   : > { %s4617_s3 = smov %s4616_s29 }
 0x921   : > { %v1681_v63 = vpop.permute.xlu0 %1680  ;;  %v1687_v4 = vpop.permute.xlu1 %1686 }
 0x922   : > { %v1690_v0 = vpack.c.bf16 %v1681_v63, %v1681_v63  ;;  %v1692_v5 = vpack.c.bf16 %v1687_v4, %v1687_v4 }
 0x924   : > { %2966 = vmatmul.mubr.msk.bf16.vlgmr.msra.gmra.mxu1 %vm1008_vm7, %v1690_v0 }
 0x925   : > { %2976 = vmatpush3.bf16.xpose.msra.mxu1 %v1849_v1  ;;  %v1684_v2 = vpop.permute.xlu0 %1683  ;;  %2977 = vmatprep.mubr.msk.bf16.mxu1 %vm3629_vm5, %v3628_v14 }
 0x926   : > { %v1691_v3 = vpack.c.bf16 %v1684_v2, %v1684_v2  ;;  %2987 = vmatprep.subr.bf16.mxu1 %v3628_v14 }
 0x928   : > { %2972 = vmatmul.mubr.msk.bf16.vlgmr.msra.gmra.mxu0 %vm1008_vm7, %v1691_v3 }
 0x929   : > { %2983 = vmatprep.mubr.msk.bf16.mxu0 %vm3629_vm5, %v3628_v14 }
 0x92c   : > { %2978 = vmatmul.mubr.msk.bf16.vlgmr.msra.gmra.mxu1 %vm1008_vm7, %v1692_v5 }
 0x92d   : > { %2989 = vmatprep.mubr.msk.bf16.mxu1 %vm3629_vm5, %v3628_v14 }
 0x971   : > { %v1747_v6 = vpop.f32.mrf.mxu0 }
 0x972   : > { %v1891_v8 = vmul.f32 0.35355338, %v1747_v6 }
 0x973   : > { %v2961_v9 = vpop.f32.mrf.mxu0 }
 0x974   : > { %v1896_v10 = vadd.f32 %v1895_v7, %v1891_v8 }
 0x975   : > { %v1750_v12 = vpop.f32.mrf.mxu0 }
 0x976   : > { %v1900_v13 = vsel %vm1008_vm7, %v1896_v10, -inf }
 0x977   : > { %1901 = vmax.xlane.f32.xlu0 %v1900_v13  ;;  %v2962_v15 = vpop.f32.mrf.mxu0 }
 0x9e4   : > { %v1793_v17 = vpop.f32.mrf.mxu1 }
 0x9e5   : > { %v1892_v18 = vmul.f32 0.35355338, %v1793_v17 }
 0x9e6   : > { %v2967_v19 = vpop.f32.mrf.mxu1 }
 0x9e7   : > { %v1897_v20 = vadd.f32 %v1895_v7, %v1892_v18 }
 0x9e8   : > { %v1796_v21 = vpop.f32.mrf.mxu1  ;;  %v1839_v22 = vpop.f32.mrf.mxu0 }
 0x9e9   : > { %v1893_v23 = vmul.f32 0.35355338, %v1839_v22  ;;  %v1903_v24 = vsel %vm1008_vm7, %v1897_v20, -inf }
 0x9ea   : > { %v2973_v25 = vpop.f32.mrf.mxu0  ;;  %1904 = vmax.xlane.f32.xlu1 %v1903_v24  ;;  %v2968_v26 = vpop.f32.mrf.mxu1 }
 0x9eb   : > { %v1898_v27 = vadd.f32 %v1895_v7, %v1893_v23 }
 0x9ec   : > { %v1842_v30 = vpop.f32.mrf.mxu0  ;;  %v1885_v16 = vpop.f32.mrf.mxu1 }
 0x9ed   : > { %v1894_v31 = vmul.f32 0.35355338, %v1885_v16  ;;  %v1906_v32 = vsel %vm1008_vm7, %v1898_v27, -inf  ;;  %v3211_v30 = vld [vmem:[%s4609_s11] sm:$0xff]  }
 0x9ee   : > { %1907 = vmax.xlane.f32.xlu0 %v1906_v32  ;;  %v2974_v33 = vpop.f32.mrf.mxu0  ;;  %v2979_v34 = vpop.f32.mrf.mxu1 }
 0x9ef   : > { %v1899_v35 = vadd.f32 %v1895_v7, %v1894_v31 }
 0x9f0   : > { %v1888_v36 = vpop.f32.mrf.mxu1 }
 0x9f1   : > { %v1909_v28 = vsel %vm1008_vm7, %v1899_v35, -inf }
 0x9f2   : > { %1910 = vmax.xlane.f32.xlu0 %v1909_v28  ;;  %v2980_v38 = vpop.f32.mrf.mxu1 }
 0x9fb   : > { %1949 = vrot.lane.b32.xlu1 %v4271_v45, %s3633_s21 }
 0xa00   : > { %v1902_v39 = vpop.xlane.xlu0 %1901 }
 0xa01   : > { %v1912_v40 = vsub.f32 %v1896_v10, %v1902_v39 }
 0xa03   : > { %v1916_v41 = vmul.f32 1.442695, %v1912_v40 }
 0xa05   : > { %3236 = vpow2.f32 %v1916_v41 }
 0xa12   : > { %v3237_v43 = vpop.eup %3236 }
 0xa13   : > { %v1924_v44 = vsel %vm1008_vm7, %v3237_v43, 0.0 }
 0xa1f   : > { %1925 = vadd.xlane.f32.xlu1 %v1924_v44 }
 0xa73   : > { %v1905_v46 = vpop.xlane.xlu1 %1904 }
 0xa74   : > { %v1913_v47 = vsub.f32 %v1897_v20, %v1905_v46 }
 0xa76   : > { %v1918_v48 = vmul.f32 1.442695, %v1913_v47 }
 0xa77   : > { %v1908_v49 = vpop.xlane.xlu0 %1907  ;;  %v1950_v50 = vpop.permute.xlu1 %1949 }
 0xa78   : > { %3238 = vpow2.f32 %v1918_v48  ;;  %v1914_v52 = vsub.f32 %v1898_v27, %v1908_v49  ;;  %v1955_v53 = vsel %vm1264_vm8, %v1950_v50, 0  ;;  %v3210_v27 = vld [vmem:[%s4608_s1 + $0x8] sm:$0xff]  }
 0xa79   : > { %2982 = vmatpush3.bf16.msra.mxu0 %v1955_v53 }
 0xa7a   : > { %v1920_v55 = vmul.f32 1.442695, %v1914_v52  ;;  %2993 = vmatprep.subr.bf16.mxu0 %v3628_v14  ;;  %v1674_v52 = vld [vmem:[%s877_s15] sm:$0x7]  ;;  %s4611_s15 = scalar_lea.vmem [#allocation13], %s4056_s27 }
 0xa7b   : > { %v1911_v45 = vpop.xlane.xlu0 %1910  ;;  %v2163_v53 = vrot.slane %v1674_v52, %v4232_v11  ;;  %s4612_s0 = smov %s4611_s15 }
 0xa7c   : > { %3240 = vpow2.f32 %v1920_v55  ;;  %v1915_v56 = vsub.f32 %v1899_v35, %v1911_v45 }
 0xa7e   : > { %v1922_v57 = vmul.f32 1.442695, %v1915_v56 }
 0xa80   : > { %3242 = vpow2.f32 %v1922_v57 }
 0xa85   : > { %v3239_v58 = vpop.eup %3238 }
 0xa86   : > { %v1927_v59 = vsel %vm1008_vm7, %v3239_v58, 0.0 }
 0xa87   : > { %1928 = vadd.xlane.f32.xlu0 %v1927_v59 }
 0xa89   : > { %v3241_v60 = vpop.eup %3240 }
 0xa8a   : > { %v1930_v61 = vsel %vm1008_vm7, %v3241_v60, 0.0 }
 0xa8b   : > { %1931 = vadd.xlane.f32.xlu1 %v1930_v61 }
 0xa8d   : > { %v3243_v63 = vpop.eup %3242 }
 0xa8e   : > { %v1933_v0 = vsel %vm1008_vm7, %v3243_v63, 0.0 }
 0xa8f   : > { %1934 = vadd.xlane.f32.xlu0 %v1933_v0 }
 0xa9c   : > { %2047 = vrot.lane.b32.xlu1 %v4282_v54, %s3633_s21 }
 0xaa0   : > { %2096 = vrot.lane.b32.xlu1 %v4293_v62, %s3633_s21 }
 0xaa5   : > { %1998 = vrot.lane.b32.xlu0 %v4277_v51, %s3633_s21  ;;  %s2419_s21 = scalar_lea.sflag [#allocation6], %s4024_s13 }
 0xaa8   : > { %v1926_v1 = vpop.xlane.xlu1 %1925 }
 0xaa9   : > { %3244 = vrcp.f32 %v1926_v1 }
 0xab6   : > { %v3245_v2 = vpop.eup %3244 }
 0xab7   : > { %v1940_v3 = vmul.f32 %v3245_v2, %v3237_v43 }
 0xab9   : > { %v1944_v4 = vpack.c.bf16 %v1940_v3, %v1940_v3  ;;  %v3212_v3 = vld [vmem:[%s4611_s15 + $0x8] sm:$0xff]  }
 0xabb   : > { %2984 = vmatmul.mubr.msk.bf16.vlgmr.msra.gmra.mxu0 %vm1008_vm7, %v1944_v4  ;;  %v3213_v4 = vld [vmem:[%s4612_s0] sm:$0xff]  }
 0xabc   : > { %2995 = vmatprep.mubr.msk.bf16.mxu0 %vm3629_vm5, %v3628_v14 }
 0xb10   : > { %v1929_v5 = vpop.xlane.xlu0 %1928 }
 0xb11   : > { %3246 = vrcp.f32 %v1929_v5  ;;  %v3215_v5 = vld [vmem:[%s4107_s18 + $0x10] sm:$0xff]  }
 0xb14   : > { %v1932_v6 = vpop.xlane.xlu1 %1931 }
 0xb15   : > { %3248 = vrcp.f32 %v1932_v6 }
 0xb18   : > { %v2048_v54 = vpop.permute.xlu1 %2047  ;;  %v1935_v7 = vpop.xlane.xlu0 %1934 }
 0xb19   : > { %v2053_v62 = vsel %vm1264_vm8, %v2048_v54, 0  ;;  %3250 = vrcp.f32 %v1935_v7 }
 0xb1a   : > { %2994 = vmatpush3.bf16.msra.mxu0 %v2053_v62  ;;  %v2236_v62 = vrot.slane %v1674_v52, %v4256_v29 }
 0xb1b   : > { %3005 = vmatprep.subr.bf16.mxu0 %v3628_v14 }
 0xb1c   : > { %v1999_v51 = vpop.permute.xlu0 %1998  ;;  %v2097_v12 = vpop.permute.xlu1 %2096 }
 0xb1d   : > { %v2004_v8 = vsel %vm1264_vm8, %v1999_v51, 0  ;;  %v2102_v17 = vsel %vm1264_vm8, %v2097_v12, 0 }
 0xb1e   : > { %v3247_v9 = vpop.eup %3246  ;;  %2988 = vmatpush3.bf16.msra.mxu1 %v2004_v8  ;;  %v2241_v8 = vrot.slane %v1674_v52, %v4258_v37 }
 0xb1f   : > { %2999 = vmatprep.subr.bf16.mxu1 %v3628_v14  ;;  %v1941_v10 = vmul.f32 %v3247_v9, %v3239_v58 }
 0xb21   : > { %v1945_v13 = vpack.c.bf16 %v1941_v10, %v1941_v10 }
 0xb22   : > { %v3249_v15 = vpop.eup %3248 }
 0xb23   : > { %2990 = vmatmul.mubr.msk.bf16.vlgmr.msra.gmra.mxu1 %vm1008_vm7, %v1945_v13  ;;  %v1942_v18 = vmul.f32 %v3249_v15, %v3241_v60  ;;  %v3216_v15 = vld [vmem:[%s4107_s18 + $0x8] sm:$0xff]  }
 0xb24   : > { %3000 = vmatpush3.bf16.msra.mxu1 %v2102_v17  ;;  %3001 = vmatprep.mubr.msk.bf16.mxu1 %vm3629_vm5, %v3628_v14  ;;  %v3217_v17 = vld [vmem:[%s4107_s18] sm:$0xff]  }
 0xb25   : > { %v1946_v19 = vpack.c.bf16 %v1942_v18, %v1942_v18  ;;  %3013 = vmatprep.subr.bf16.mxu1 %v3628_v14  ;;  %v2802_v18 = vld [vmem:[%s4109_s5] ss:$0 sm:$0xff]  ;;  %s2432_s5 = sshll.u32 %s4113_s26, 4  ;;  %s2433_s5 = int_to_ptr.vmem [resolvable:$true] %s2432_s5 }
 0xb26   : > { %v3251_v20 = vpop.eup %3250  ;;  %s3452_s6 = scalar_lea.vmem %s2433_s5, 128 }
 0xb27   : > { %2996 = vmatmul.mubr.msk.bf16.vlgmr.msra.gmra.mxu0 %vm1008_vm7, %v1946_v19  ;;  %v1943_v21 = vmul.f32 %v3251_v20, %v3243_v63  ;;  %p3453_p9 = scmp.ne.s32.totalorder %s2433_s5, %s3452_s6 }
 0xb28   : > { %3009 = vmatprep.mubr.msk.bf16.mxu0 %vm3629_vm5, %v3628_v14  ;;  %3006 = vmatpush3.bf16.msra.mxu0 %v3210_v27 }
 0xb29   : > { %v1947_v22 = vpack.c.bf16 %v1943_v21, %v1943_v21  ;;  %3007 = vmatprep.subr.bf16.mxu0 %v3628_v14  ;;  %p3454_p3 = pnand %p3453_p9, %p4618_p7 }
 0xb2b   : > { %3002 = vmatmul.mubr.msk.bf16.vlgmr.msra.gmra.mxu1 %vm1008_vm7, %v1947_v22  ;;  %p3455_p5 = pneg %p3454_p3 }
 0xb2c   : > { %3017 = vmatprep.mubr.msk.bf16.mxu1 %vm3629_vm5, %v3628_v14  ;;  %3008 = vmatpush3.bf16.msra.mxu0 %v3211_v30 }
 0xb2d   : > { %3021 = vmatprep.subr.bf16.mxu0 %v3628_v14  ;;  %3014 = vmatpush3.bf16.msra.mxu1 %v3212_v3 }
 0xb2e   : > { %3015 = vmatprep.subr.bf16.mxu1 %v3628_v14 }
 0xb31   : > { %3016 = vmatpush3.bf16.msra.mxu1 %v3213_v4 }
 0xb7b   : > { %v1991_v23 = vpop.f32.mrf.mxu0 }
 0xb7d   : > { %v2985_v24 = vpop.f32.mrf.mxu0 }
 0xb7f   : > { %v1994_v25 = vpop.f32.mrf.mxu0 }
 0xb81   : > { %v2986_v26 = vpop.f32.mrf.mxu0 }
 0xb82   : > { %v2320_v26 = vld [vmem:[%s886_s28] sm:$0x7] }
 0xb83   : > { %v2324_v27 = vrot.slane %v2320_v26, %v4232_v11 }
 0xbe3   : > { %v2040_v16 = vpop.f32.mrf.mxu1 }
 0xbe4   : > { %2145 = vrot.lane.b32.xlu0 %v2040_v16, %s3635_s9  ;;  %s3638_s9 = smov [#allocation16]  }
 0xbe5   : > { %v2991_v31 = vpop.f32.mrf.mxu1 }
 0xbe7   : > { %v2043_v32 = vpop.f32.mrf.mxu1  ;;  %v2089_v33 = vpop.f32.mrf.mxu0 }
 0xbe8   : > { %2149 = vrot.lane.b32.xlu1 %v2089_v33, %s3636_s16  ;;  %s3456_s16 = sshll.u32 %s3638_s9, 4  ;;  %s3457_s16 = int_to_ptr.vmem [resolvable:$false] %s3456_s16 }
 0xbe9   : > { %v2992_v34 = vpop.f32.mrf.mxu1  ;;  %v2997_v35 = vpop.f32.mrf.mxu0  ;;  %p3459_p4 = scmp.lt.s32.totalorder %s2433_s5, %s3457_s16 }
 0xbeb   : > { %v2092_v36 = vpop.f32.mrf.mxu0  ;;  %v2138_v28 = vpop.f32.mrf.mxu1 }
 0xbec   : > { %2153 = vrot.lane.b32.xlu0 %v2138_v28, %s3637_s22  ;;  %s3458_s22 = scalar_lea.vmem %s3457_s16, 256 }
 0xbed   : > { %v2998_v38 = vpop.f32.mrf.mxu0  ;;  %v3003_v39 = vpop.f32.mrf.mxu1  ;;  %p3460_p8 = scmp.lt.s32.totalorder %s3458_s22, %s3452_s6 }
 0xbef   : > { %v2141_v40 = vpop.f32.mrf.mxu1  ;;  %p3461_p0 = por %p3460_p8, %p3459_p4 }
 0xbf1   : > { %v3004_v41 = vpop.f32.mrf.mxu1  ;;  %p3462_p11 = pnand %p3461_p0, %p3455_p5 }
 0xc56   : > { %v2146_v43 = vpop.permute.xlu0 %2145 }
 0xc57   : > { %v2156_v46 = vsel %vm1008_vm7, %v1991_v23, %v2146_v43  ;;  %v2410_v43 = vrot.slane %v2320_v26, %v4256_v29 }
 0xc5a   : > { %v2150_v44 = vpop.permute.xlu1 %2149 }
 0xc5b   : > { %v2157_v47 = vsel %vm1465_vm9, %v2156_v46, %v2150_v44  ;;  %v2415_v46 = vrot.slane %v2320_v26, %v4258_v37 }
 0xc5e   : > { %v2154_v48 = vpop.permute.xlu0 %2153 }
 0xc5f   : > { %v2158_v49 = vsel %vm1467_vm10, %v2157_v47, %v2154_v48 }
 0xc60   : > { %v2159_v50 = vpack.c.bf16 %v2158_v49, %v2158_v49 }
 0xc62   : > { %3010 = vmatmul.mubr.msk.bf16.vlgmr.msra.gmra.mxu0 %vm942_vm6, %v2159_v50 }
 0xc63   : > { %3029 = vmatprep.mubr.msk.bf16.mxu0 %vm3629_vm5, %v3628_v14 }
 0xd22   : > { %v2213_v55 = vpop.f32.mrf.mxu0 }
 0xd23   : > { %v2214_v45 = vadd.f32 %v2213_v55, %v2163_v53 }
 0xd24   : > { %v3011_v56 = vpop.f32.mrf.mxu0 }
 0xd25   : > { %v2219_v57 = vadd.f32 %v2214_v45, %v4262_v42  ;;  %v3214_v42 = vld [vmem:[%s4107_s18 + $0x18] sm:$0xff]   ;;  %s4614_s18 = sld [smem:[#allocation32_spill]] }
 0xd26   : > { %v2216_v58 = vpop.f32.mrf.mxu0  ;;  %3022 = vmatpush3.bf16.msra.mxu0 %v3214_v42 }
 0xd27   : > { %v2220_v59 = vsel %vm942_vm6, %v2219_v57, 0.0  ;;  %3023 = vmatprep.subr.bf16.mxu0 %v3628_v14 }
 0xd28   : > { %2221 = vadd.xlane.f32.xlu1 %v2220_v59  ;;  %v3012_v60 = vpop.f32.mrf.mxu0 }
 0xd2a   : > { %3024 = vmatpush3.bf16.msra.mxu0 %v3215_v5 }
 0xd2b   : > { %3025 = vmatprep.subr.bf16.mxu0 %v3628_v14  ;;  %s2812_s28 = sshll.u32 %s4614_s18, 7 }
 0xd2c   : > { %s2430_s30 = scalar_lea.hbm %s4616_s29, %s2812_s28 }
 0xd2e   : > { %3026 = vmatpush3.bf16.msra.mxu0 %v3216_v15 }
 0xd2f   : > { %3027 = vmatprep.subr.bf16.mxu0 %v3628_v14 }
 0xd32   : > { %3028 = vmatpush3.bf16.msra.mxu0 %v3217_v17 }
 0xdb1   : > { %v2222_v61 = vpop.xlane.xlu1 %2221 }
 0xdb2   : > { %v2223_v63 = vmul.f32 0.03125, %v2222_v61 }
 0xdb4   : > { %v2224_v0 = vsub.f32 %v2219_v57, %v2223_v63 }
 0xdb6   : > { %v2225_v1 = vmul.f32 %v2224_v0, %v2224_v0 }
 0xdb8   : > { %v2226_v2 = vsel %vm942_vm6, %v2225_v1, 0.0 }
 0xdb9   : > { %2227 = vadd.xlane.f32.xlu0 %v2226_v2 }
 0xe42   : > { %v2228_v6 = vpop.xlane.xlu0 %2227 }
 0xe43   : > { %v2229_v54 = vmul.f32 0.03125, %v2228_v6 }
 0xe45   : > { %v2230_v7 = vadd.f32 1e-06, %v2229_v54 }
 0xe47   : > { %3252 = vrsqrt.f32 %v2230_v7 }
 0xe54   : > { %v3253_v51 = vpop.eup %3252 }
 0xe55   : > { %v2232_v9 = vmul.f32 %v3253_v51, %v2224_v0 }
 0xe57   : > { %v2237_v10 = vmul.f32 %v2236_v62, %v2232_v9 }
 0xe59   : > { %v2242_v12 = vadd.f32 %v2241_v8, %v2237_v10 }
 0xe5b   : > { %v2243_v13 = vpack.c.bf16 %v2242_v12, %v2242_v12 }
 0xe5d   : > { %3018 = vmatmul.mubr.msk.bf16.vlgmr.msra.gmra.mxu1 %vm942_vm6, %v2243_v13 }
 0xf1d   : > { %v2304_v19 = vpop.f32.mrf.mxu1 }
 0xf1e   : > { %v2305_v20 = vadd.f32 %v2802_v18, %v2304_v19 }
 0xf1f   : > { %v3019_v21 = vpop.f32.mrf.mxu1 }
 0xf20   : > { %v2310_v22 = vmax.f32 %v2305_v20, 0.0 }
 0xf21   : > { %v2307_v23 = vpop.f32.mrf.mxu1 }
 0xf22   : > { %v2311_v24 = vpack.c.bf16 %v2310_v22, %v2310_v22 }
 0xf23   : > { %v3020_v25 = vpop.f32.mrf.mxu1 }
 0xf24   : > { %3030 = vmatmul.mubr.msk.bf16.vlgmr.msra.gmra.mxu0 %vm2349_vm11, %v2311_v24 }
 0xfe4   : > { %v2387_v14 = vpop.f32.mrf.mxu0 }
 0xfe5   : > { %v2388_v30 = vadd.f32 %v2387_v14, %v2324_v27 }
 0xfe6   : > { %v3031_v16 = vpop.f32.mrf.mxu0 }
 0xfe7   : > { %v2393_v31 = vadd.f32 %v2388_v30, %v2242_v12 }
 0xfe8   : > { %v2390_v32 = vpop.f32.mrf.mxu0 }
 0xfe9   : > { %v2394_v33 = vsel %vm942_vm6, %v2393_v31, 0.0 }
 0xfea   : > { %2395 = vadd.xlane.f32.xlu0 %v2394_v33  ;;  %v3032_v34 = vpop.f32.mrf.mxu0 }
0x1073   : > { %v2396_v35 = vpop.xlane.xlu0 %2395 }
0x1074   : > { %v2397_v36 = vmul.f32 0.03125, %v2396_v35 }
0x1076   : > { %v2398_v28 = vsub.f32 %v2393_v31, %v2397_v36 }
0x1078   : > { %v2399_v38 = vmul.f32 %v2398_v28, %v2398_v28 }
0x107a   : > { %v2400_v39 = vsel %vm942_vm6, %v2399_v38, 0.0 }
0x107b   : > { %2401 = vadd.xlane.f32.xlu1 %v2400_v39 }
0x1104   : > { %v2402_v11 = vpop.xlane.xlu1 %2401 }
0x1105   : > { %v2403_v40 = vmul.f32 0.03125, %v2402_v11 }
0x1107   : > { %v2404_v41 = vadd.f32 1e-06, %v2403_v40 }
0x1109   : > { %3254 = vrsqrt.f32 %v2404_v41 }
0x1116   : > { %v3255_v44 = vpop.eup %3254 }
0x1117   : > { %v2406_v47 = vmul.f32 %v3255_v44, %v2398_v28 }
0x1119   : > { %v2411_v48 = vmul.f32 %v2410_v43, %v2406_v47 }
0x111b   : > { %v2416_v49 = vadd.f32 %v2415_v46, %v2411_v48 }
0x111d   : > { %2417 = vst.msk [vmem:[%s4113_s26] sm:$0xff] %vm942_vm6, %v2416_v49 }
0x111e   : > { %3465 = shalt.err (!%p3462_p11)
}
0x111f   : > { %s3466_s10 = scalar_lea.hbm %s2430_s30, 128  ;;  %s3470_s24 = scalar_lea.hbm %s4617_s3, 256 }
0x1120   : > { %p3467_p10 = scmp.ne.s32.totalorder %s2430_s30, %s3466_s10  ;;  %p3471_p6 = scmp.lt.s32.totalorder %s2430_s30, %s4617_s3 }
0x1121   : > { %p3472_p1 = scmp.lt.s32.totalorder %s3470_s24, %s3466_s10 }
0x1122   : > { %p3468_p12 = pnand %p3467_p10, %p4618_p7 }
0x1123   : > { %p3473_p13 = por %p3472_p1, %p3471_p6 }
0x1124   : > { %p3469_p2 = pneg %p3468_p12 }
0x1126   : > { %p3474_p9 = pnand %p3473_p13, %p3469_p2 }
0x1128   : > { %3477 = shalt.err (!%p3474_p9)
}
0x1129   : > { %3047 = dma.vmem_to_hbm [thread:$0]  (%p4618_p7), %s2433_s5, 128, %s2430_s30, %s2419_s21  }
0x112a PF: > { %s4619_s7 = sld [smem:[#allocation35_spill]] }
0x112b   : > { %s4620_s1 = sld [smem:[#allocation28_spill]] }
0x112c   : > { %s4621_s11 = sld [smem:[#allocation43_spill]] }
0x1130   : > { %p3076_p3 = scmp.ge.s32.totalorder %s4619_s7, 2 }
0x1131   : > { %s2444_s4 = sand.u32 1, %s4620_s1  }
0x1132   : > { %p4622_p5 = scmp.ne.s32.totalorder %s4621_s11, 0  ;;  %s2445_s14 = scalar_lea.sflag [#allocation6], %s2444_s4 }
0x1134   : > { %p3072_p4 = pnand %p3076_p3, %p4622_p5 }
0x1136   : > { %p3073_p8 = pneg %p3072_p4 }
0x1138   : > { %3559 = dma.done.wait (%p3073_p8), %s2445_s14, 128  }
0x1139   : > { %3561 = vsyncadd (%p3073_p8), %s2445_s14, 4294967168  ;;  %s40_s16 = sadd.s32 1, %s4619_s7   ;;  %s4624_s18 = sld [smem:[#allocation24_spill]] }
0x113a   : > { %p4418_p0 = scmp.ge.s32.totalorder %s40_s16, 6   ;;  %s4625_s15 = sld [smem:[#allocation25_spill]] }
0x113b   : > { %s4626_s20 = sld [smem:[#allocation44_spill]] }
0x113c   : > { %s4627_s21 = sld [smem:[#allocation26_spill]] }
0x113d   : > { %s4628_s22 = sld [smem:[#allocation27_spill]] }
0x113e   : > { %s4629_s23 = sld [smem:[#allocation40_spill]] }
0x113f   : > { %s4630_s24 = sld [smem:[#allocation29_spill]] }
0x1140   : > { %s4631_s25 = sld [smem:[#allocation30_spill]]  ;;  %s4638_s19 = smov %s4625_s15 }
0x1141   : > { %s4632_s26 = sld [smem:[#allocation41_spill]]  ;;  %39 = sbr.rel (!%p4418_p0) target bundleno = 33 (0x21), region = 225 }
0x1142   : > { %s4633_s27 = sld [smem:[#allocation33_spill]] }
0x1143   : > { %s4634_s28 = sld [smem:[#allocation34_spill]] }
0x1144   : > { %s4635_s29 = sld [smem:[#allocation37_spill]] }
0x1145   : > { %s4636_s30 = sld [smem:[#allocation38_spill]] }
0x1146   :  { %2450 = vsyncpa [#allocation5], 1 }
0x1147   :  { %2452 = vsyncpa [#allocation5 + $0x1], 1 }
0x1148   :  { %2453 = vsyncpa [#allocation8], 1 }
0x1149   :  { %2455 = vsyncpa [#allocation8 + $0x1], 1 }
0x114a   :  { %2456 = vsyncpa [#allocation11], 1 }
0x114b   :  { %2458 = vsyncpa [#allocation11 + $0x1], 1 }
0x114c   :  { %2459 = vsyncpa [#allocation14], 1 }
0x114d   :  { %2461 = vsyncpa [#allocation14 + $0x1], 1 }
0x114e   :  { %2462 = vsyncpa [#allocation6], 1 }
0x114f   :  { %2464 = vsyncpa [#allocation6 + $0x1], 1 }

</bundles_post_ra>
